<compile_context>
chip_gen: v7x
topology: tpu7x:2x2x1
jax: 0.10.0
libtpu: 0.0.40
codegen_flags: <defaults>
</compile_context>

<pallas_src>
import math
import functools

import jax
import jax.numpy as jnp
from jax import lax
from jax.experimental import pallas as pl
from jax.experimental.pallas import tpu as pltpu


def _transformer_layer_kernel(
    x_ref,        # (BL, C)   rows of B batch elements, L tokens each
    wqkv_ref,     # (C, 3C)   fused (outer q/k/v Linear @ MHA in_proj), bf16, q pre-scaled
    bqkv_ref,     # (1, 3C)   MHA in_proj bias (q part pre-scaled), f32
    wo_ref,       # (C, C)    MHA out_proj weight (pre-transposed), bf16
    bo_ref,       # (1, C)    MHA out_proj bias, f32
    wff_ref,      # (C, C)    fused fc1 @ fc2 weight (pre-transposed), bf16
    o_ref,        # (BL, C)   output
    *, block_batch, seq_len, channels, num_heads, head_dim,
):
    f32 = jnp.float32
    bf16 = jnp.bfloat16
    B, L, C, H, hd = block_batch, seq_len, channels, num_heads, head_dim
    BL = B * L

    x = x_ref[...].astype(f32)                                        # (BL, C)
    xb = x.astype(bf16)

    # --- fused q/k/v projection (outer Linear folded into MHA in_proj) -----
    qkv = jnp.dot(xb, wqkv_ref[...], preferred_element_type=f32) + bqkv_ref[...]
    q = qkv[:, 0 * C:1 * C].astype(bf16)        # 1/sqrt(hd) already folded in
    k = qkv[:, 1 * C:2 * C].astype(bf16)
    v = qkv[:, 2 * C:3 * C].astype(bf16)

    wo = wo_ref[...]                                                  # (C, C) bf16

    # --- per-head attention (batched over B) with out_proj accumulation ----
    # No attention scratch slab: each head's contribution goes straight into
    # the full-width (BL, C) f32 accumulator via a lane-dense matmul, so there
    # are no masked hd-wide stores.
    a = jnp.zeros((BL, C), f32)
    for h in range(H):
        lo = h * hd
        qh = q[:, lo:lo + hd].reshape(B, L, hd)
        kh = k[:, lo:lo + hd].reshape(B, L, hd)
        vh = v[:, lo:lo + hd].reshape(B, L, hd)
        # s[b, i, j] = qh[b, i, :] . kh[b, j, :]   (no explicit transpose)
        s = lax.dot_general(qh, kh, (((2,), (2,)), ((0,), (0,))),
                            preferred_element_type=f32)               # (B, L, L)
        s = s - jnp.max(s, axis=-1, keepdims=True)
        p = jnp.exp(s)                                                # unnormalized
        denom = jnp.sum(p, axis=-1, keepdims=True)                    # (B, L, 1)
        oh = lax.dot_general(p.astype(bf16), vh, (((2,), (1,)), ((0,), (0,))),
                             preferred_element_type=f32)              # (B, L, hd)
        # fold softmax normalization into the (much narrower) output
        oh = oh * pl.reciprocal(denom, approx=True)
        # accumulate this head's out_proj contribution: (BL, hd) @ (hd, C)
        a = a + jnp.dot(oh.reshape(BL, hd).astype(bf16), wo[lo:lo + hd, :],
                        preferred_element_type=f32)

    # --- MHA out_proj bias + residual ---------------------------------------
    x1 = a + bo_ref[...] + x

    # --- fused feed-forward fc2(fc1(x1)) + residual --------------------------
    ff = jnp.dot(x1.astype(bf16), wff_ref[...], preferred_element_type=f32)
    o_ref[...] = (ff + x1).astype(o_ref.dtype)


def _choose_block_batch(n, seq_len, channels, num_heads,
                        target_rows=512, vmem_budget_bytes=12 * 1024 * 1024):
    """Pick the per-grid-step batch B.

    Constraints:
      * n % B == 0 and B <= max(1, n // 2)  -> grid has >= 2 steps when n >= 2,
        so both v7x TensorCores get work via the 'parallel' grid axis.
      * B * seq_len <= target_rows and (B * seq_len) % 8 == 0 (8,128 tiling).
      * rough per-step VMEM working set fits under vmem_budget_bytes
        (guards against the (B, L, L) f32 score tensor on v7x's 64 MiB VMEM).
    Fallback is 1 (never the whole batch).
    """
    head_dim = channels // num_heads

    def vmem_est(b):
        bl = b * seq_len
        slabs = 4 * bl * channels * 4                      # in/out slabs, double-buffered, f32
        weights = 5 * channels * channels * 2 + 4 * channels * 4
        qkv = bl * 3 * channels * (4 + 2)                  # f32 result + bf16 copies
        attn = b * seq_len * seq_len * (4 + 2) + b * seq_len * head_dim * 6
        acc = 2 * bl * channels * 4                        # a accumulator + x1
        return int(1.5 * (slabs + weights + qkv + attn + acc))

    max_b = max(1, n // 2)
    candidates = [
        b for b in range(1, max_b + 1)
        if n % b == 0
        and b * seq_len <= target_rows
        and (b * seq_len) % 8 == 0
        and vmem_est(b) <= vmem_budget_bytes
    ]
    if candidates:
        return max(candidates)
    if seq_len % 8 == 0 or n == 1:
        return 1
    # Only remaining (8,128)-legal block shape is the full array.
    return n


def transformer_layer_pallas(x_lnc, params, num_heads, *,
                             target_rows=512, vmem_limit_bytes=None):
    """x_lnc: (L, N, C) like PyTorch's nn.MultiheadAttention input."""
    L, N, C = x_lnc.shape
    assert C % num_heads == 0
    hd = C // num_heads
    scale = 1.0 / math.sqrt(hd)

    f32 = jnp.float32
    bf16 = jnp.bfloat16

    # ---- host-side weight fusion (f32), matmul operands cast to bf16 -------
    in_w = params["in_proj_weight"].astype(f32)                       # (3C, C)
    in_b = params["in_proj_bias"].astype(f32)                         # (3C,)
    wq_f = params["wq"].astype(f32).T @ in_w[0 * C:1 * C].T           # (C, C)
    wk_f = params["wk"].astype(f32).T @ in_w[1 * C:2 * C].T
    wv_f = params["wv"].astype(f32).T @ in_w[2 * C:3 * C].T
    # fold the 1/sqrt(head_dim) attention scale into the q weight + bias
    w_qkv = jnp.concatenate([wq_f * scale, wk_f, wv_f], axis=1)       # (C, 3C)
    b_qkv = jnp.concatenate([in_b[0 * C:1 * C] * scale,
                             in_b[1 * C:2 * C],
                             in_b[2 * C:3 * C]]).reshape(1, 3 * C)
    w_o = params["out_proj_weight"].astype(f32).T                     # (C, C)
    b_o = params["out_proj_bias"].astype(f32).reshape(1, C)
    w_ff = params["w_fc1"].astype(f32).T @ params["w_fc2"].astype(f32).T

    w_qkv = w_qkv.astype(bf16)
    w_o = w_o.astype(bf16)
    w_ff = w_ff.astype(bf16)

    # ---- layout: (L, N, C) -> (N*L, C) row slab -----------------------------
    x_rows = jnp.transpose(x_lnc, (1, 0, 2)).reshape(N * L, C)

    B = _choose_block_batch(N, L, C, num_heads, target_rows=target_rows)
    BL = B * L
    grid = (N // B,)

    kernel = functools.partial(
        _transformer_layer_kernel,
        block_batch=B, seq_len=L, channels=C,
        num_heads=num_heads, head_dim=hd,
    )

    cp_kwargs = dict(dimension_semantics=("parallel",))
    if vmem_limit_bytes is not None:
        cp_kwargs["vmem_limit_bytes"] = vmem_limit_bytes
    compiler_params = pltpu.CompilerParams(**cp_kwargs)

    def _run(single_buffer_weights):
        row_spec = pl.BlockSpec((BL, C), lambda i: (i, 0))
        if single_buffer_weights:
            # Weights/biases are grid-invariant (index_map constant): single
            # buffering halves their VMEM residency.
            def wspec(shape):
                return pl.BlockSpec(shape, lambda i: (0, 0),
                                    pipeline_mode=pl.Buffered(1))
        else:
            def wspec(shape):
                return pl.BlockSpec(shape, lambda i: (0, 0))

        out_rows = pl.pallas_call(
            kernel,
            out_shape=jax.ShapeDtypeStruct((N * L, C), x_lnc.dtype),
            grid_spec=pltpu.PrefetchScalarGridSpec(
                num_scalar_prefetch=0,
                grid=grid,
                in_specs=[row_spec,
                          wspec((C, 3 * C)),
                          wspec((1, 3 * C)),
                          wspec((C, C)),
                          wspec((1, C)),
                          wspec((C, C))],
                out_specs=row_spec,
            ),
            compiler_params=compiler_params,
        )(x_rows, w_qkv, b_qkv, w_o, b_o, w_ff)
        return jax.block_until_ready(out_rows)

    try:
        out_rows = _run(single_buffer_weights=True)
    except Exception:
        # Older/other JAX builds without BlockSpec pipeline_mode support:
        # fall back to default (double-buffered) weight specs.
        out_rows = _run(single_buffer_weights=False)

    return jnp.transpose(out_rows.reshape(N, L, C), (1, 0, 2))        # (L, N, C)


def transformer_layer_ref(x_lnc, params, num_heads):
    """Pure-JAX reference with the original (unfused) math, for validation."""
    L, N, C = x_lnc.shape
    hd = C // num_heads
    x = x_lnc.astype(jnp.float32)
    q = jnp.einsum("lnc,dc->lnd", x, params["wq"])
    k = jnp.einsum("lnc,dc->lnd", x, params["wk"])
    v = jnp.einsum("lnc,dc->lnd", x, params["wv"])
    in_w = params["in_proj_weight"]
    in_b = params["in_proj_bias"]
    q = jnp.einsum("lnc,dc->lnd", q, in_w[0 * C:1 * C]) + in_b[0 * C:1 * C]
    k = jnp.einsum("lnc,dc->lnd", k, in_w[1 * C:2 * C]) + in_b[1 * C:2 * C]
    v = jnp.einsum("lnc,dc->lnd", v, in_w[2 * C:3 * C]) + in_b[2 * C:3 * C]
    qh = q.reshape(L, N, num_heads, hd).transpose(1, 2, 0, 3) / math.sqrt(hd)
    kh = k.reshape(L, N, num_heads, hd).transpose(1, 2, 0, 3)
    vh = v.reshape(L, N, num_heads, hd).transpose(1, 2, 0, 3)
    s = jnp.einsum("nhqd,nhkd->nhqk", qh, kh)
    p = jax.nn.softmax(s, axis=-1)
    a = jnp.einsum("nhqk,nhkd->nhqd", p, vh)
    a = a.transpose(2, 0, 1, 3).reshape(L, N, C)
    a = jnp.einsum("lnc,dc->lnd", a, params["out_proj_weight"]) + params["out_proj_bias"]
    x1 = a + x
    ff = jnp.einsum("lnc,dc->lnd", x1, params["w_fc1"])
    ff = jnp.einsum("lnc,dc->lnd", ff, params["w_fc2"])
    return (ff + x1).astype(x_lnc.dtype)


def init_params(key, c):
    keys = jax.random.split(key, 9)
    s = 0.05
    return {
        "wq": jax.random.normal(keys[0], (c, c), jnp.float32) * s,
        "wk": jax.random.normal(keys[1], (c, c), jnp.float32) * s,
        "wv": jax.random.normal(keys[2], (c, c), jnp.float32) * s,
        "in_proj_weight": jax.random.normal(keys[3], (3 * c, c), jnp.float32) * s,
        "in_proj_bias": jax.random.normal(keys[4], (3 * c,), jnp.float32) * s,
        "out_proj_weight": jax.random.normal(keys[5], (c, c), jnp.float32) * s,
        "out_proj_bias": jax.random.normal(keys[6], (c,), jnp.float32) * s,
        "w_fc1": jax.random.normal(keys[7], (c, c), jnp.float32) * s,
        "w_fc2": jax.random.normal(keys[8], (c, c), jnp.float32) * s,
    }


if __name__ == "__main__":
    C = 32          # embed dim
    NUM_HEADS = 4   # -> head_dim = 8
    L = 8           # sequence length
    N = 2           # batch  -> block_batch=1, grid=(2,)

    key = jax.random.PRNGKey(0)
    k_x, k_p = jax.random.split(key)
    x = jax.random.normal(k_x, (L, N, C), jnp.float32)                # PyTorch-style (L, N, C)
    params = init_params(k_p, C)

    out = transformer_layer_pallas(x, params, NUM_HEADS)
    out = jax.block_until_ready(out)

    ref = transformer_layer_ref(x, params, NUM_HEADS)
    assert out.shape == (L, N, C)
    assert jnp.all(jnp.isfinite(out))
    max_err = float(jnp.max(jnp.abs(out.astype(jnp.float32) - ref.astype(jnp.float32))))
    assert max_err < 2e-2, f"mismatch vs JAX reference: max abs err {max_err}"
    print("KERNEL_OK")
</pallas_src>

<mosaic_0001>
module attributes {stable_mosaic.version = 11 : i64} {
  func.func @_transformer_layer_kernel(%arg0: i32, %arg1: memref<8x32xf32, #tpu.memory_space<vmem>>, %arg2: memref<32x96xbf16, #tpu.memory_space<vmem>>, %arg3: memref<1x96xf32, #tpu.memory_space<vmem>>, %arg4: memref<32x32xbf16, #tpu.memory_space<vmem>>, %arg5: memref<1x32xf32, #tpu.memory_space<vmem>>, %arg6: memref<32x32xbf16, #tpu.memory_space<vmem>>, %arg7: memref<8x32xf32, #tpu.memory_space<vmem>>) attributes {dimension_semantics = [#tpu.dimension_semantics<parallel>], iteration_bounds = array<i64: 2>, scalar_prefetch = 0 : i64, scratch_operands = 0 : i64, tpu.core_type = #tpu.core_type<tc>, window_params = [{transform_indices = @transform_0, window_bounds = array<i64: 8, 32>}, {pipeline_mode = #tpu.pipeline_mode<synchronous>, transform_indices = @transform_1, window_bounds = array<i64: 32, 96>}, {pipeline_mode = #tpu.pipeline_mode<synchronous>, transform_indices = @transform_2, window_bounds = array<i64: 1, 96>}, {pipeline_mode = #tpu.pipeline_mode<synchronous>, transform_indices = @transform_3, window_bounds = array<i64: 32, 32>}, {pipeline_mode = #tpu.pipeline_mode<synchronous>, transform_indices = @transform_4, window_bounds = array<i64: 1, 32>}, {pipeline_mode = #tpu.pipeline_mode<synchronous>, transform_indices = @transform_5, window_bounds = array<i64: 32, 32>}, {transform_indices = @transform_6, window_bounds = array<i64: 8, 32>}]} {
    %c0 = arith.constant 0 : index
    %c0_0 = arith.constant 0 : index
    %0 = vector.load %arg1[%c0, %c0_0] : memref<8x32xf32, #tpu.memory_space<vmem>>, vector<8x32xf32>
    %1 = arith.truncf %0 : vector<8x32xf32> to vector<8x32xbf16>
    %c0_1 = arith.constant 0 : index
    %c0_2 = arith.constant 0 : index
    %2 = vector.load %arg2[%c0_1, %c0_2] : memref<32x96xbf16, #tpu.memory_space<vmem>>, vector<32x96xbf16>
    %cst = arith.constant dense<0.000000e+00> : vector<8x96xf32>
    %3 = tpu.matmul %1, %2, %cst {dimension_numbers = #tpu.dot_dimension_numbers<[1], [0], [0], [1], [0, 0, 1, 1], [], []>} : vector<8x32xbf16>, vector<32x96xbf16>, vector<8x96xf32> -> vector<8x96xf32>
    %c0_3 = arith.constant 0 : index
    %c0_4 = arith.constant 0 : index
    %4 = vector.load %arg3[%c0_3, %c0_4] : memref<1x96xf32, #tpu.memory_space<vmem>>, vector<1x96xf32>
    %5 = vector.broadcast %4 : vector<1x96xf32> to vector<8x96xf32>
    %6 = arith.addf %3, %5 : vector<8x96xf32>
    %7 = vector.extract_strided_slice %6 {offsets = [0, 0], sizes = [8, 32], strides = [1, 1]} : vector<8x96xf32> to vector<8x32xf32>
    %8 = arith.truncf %7 : vector<8x32xf32> to vector<8x32xbf16>
    %9 = vector.extract_strided_slice %6 {offsets = [0, 32], sizes = [8, 32], strides = [1, 1]} : vector<8x96xf32> to vector<8x32xf32>
    %10 = arith.truncf %9 : vector<8x32xf32> to vector<8x32xbf16>
    %11 = vector.extract_strided_slice %6 {offsets = [0, 64], sizes = [8, 32], strides = [1, 1]} : vector<8x96xf32> to vector<8x32xf32>
    %12 = arith.truncf %11 : vector<8x32xf32> to vector<8x32xbf16>
    %c0_5 = arith.constant 0 : index
    %c0_6 = arith.constant 0 : index
    %13 = vector.load %arg4[%c0_5, %c0_6] : memref<32x32xbf16, #tpu.memory_space<vmem>>, vector<32x32xbf16>
    %cst_7 = arith.constant 0.000000e+00 : f32
    %14 = vector.broadcast %cst_7 : f32 to vector<8x32xf32>
    %15 = vector.extract_strided_slice %8 {offsets = [0, 0], sizes = [8, 8], strides = [1, 1]} : vector<8x32xbf16> to vector<8x8xbf16>
    %16 = vector.shape_cast %15 : vector<8x8xbf16> to vector<1x8x8xbf16>
    %17 = vector.extract_strided_slice %10 {offsets = [0, 0], sizes = [8, 8], strides = [1, 1]} : vector<8x32xbf16> to vector<8x8xbf16>
    %18 = vector.shape_cast %17 : vector<8x8xbf16> to vector<1x8x8xbf16>
    %19 = vector.extract_strided_slice %12 {offsets = [0, 0], sizes = [8, 8], strides = [1, 1]} : vector<8x32xbf16> to vector<8x8xbf16>
    %20 = vector.shape_cast %19 : vector<8x8xbf16> to vector<1x8x8xbf16>
    %cst_8 = arith.constant dense<0.000000e+00> : vector<1x8x8xf32>
    %21 = tpu.matmul %16, %18, %cst_8 {dimension_numbers = #tpu.dot_dimension_numbers<[2], [2], [1], [1], [0, 0, 0, 1, 1, 1], [0], [0]>} : vector<1x8x8xbf16>, vector<1x8x8xbf16>, vector<1x8x8xf32> -> vector<1x8x8xf32>
    %cst_9 = arith.constant dense<0xFF800000> : vector<1x8xf32>
    %22 = vector.multi_reduction <maximumf>, %21, %cst_9 [2] : vector<1x8x8xf32> to vector<1x8xf32>
    %23 = vector.shape_cast %22 : vector<1x8xf32> to vector<1x8x1xf32>
    %24 = vector.broadcast %23 : vector<1x8x1xf32> to vector<1x8x8xf32>
    %25 = arith.subf %21, %24 : vector<1x8x8xf32>
    %26 = math.exp %25 : vector<1x8x8xf32>
    %cst_10 = arith.constant dense<0.000000e+00> : vector<1x8xf32>
    %27 = vector.multi_reduction <add>, %26, %cst_10 [2] : vector<1x8x8xf32> to vector<1x8xf32>
    %28 = vector.shape_cast %27 : vector<1x8xf32> to vector<1x8x1xf32>
    %29 = arith.truncf %26 : vector<1x8x8xf32> to vector<1x8x8xbf16>
    %cst_11 = arith.constant dense<0.000000e+00> : vector<1x8x8xf32>
    %30 = tpu.matmul %29, %20, %cst_11 {dimension_numbers = #tpu.dot_dimension_numbers<[2], [1], [1], [2], [0, 0, 0, 1, 1, 2], [0], [0]>} : vector<1x8x8xbf16>, vector<1x8x8xbf16>, vector<1x8x8xf32> -> vector<1x8x8xf32>
    %31 = tpu.reciprocal %28 {approx = true} : vector<1x8x1xf32> -> vector<1x8x1xf32>
    %32 = vector.broadcast %31 : vector<1x8x1xf32> to vector<1x8x8xf32>
    %33 = arith.mulf %30, %32 : vector<1x8x8xf32>
    %34 = vector.shape_cast %33 : vector<1x8x8xf32> to vector<8x8xf32>
    %35 = arith.truncf %34 : vector<8x8xf32> to vector<8x8xbf16>
    %36 = vector.extract_strided_slice %13 {offsets = [0, 0], sizes = [8, 32], strides = [1, 1]} : vector<32x32xbf16> to vector<8x32xbf16>
    %cst_12 = arith.constant dense<0.000000e+00> : vector<8x32xf32>
    %37 = tpu.matmul %35, %36, %cst_12 {dimension_numbers = #tpu.dot_dimension_numbers<[1], [0], [0], [1], [0, 0, 1, 1], [], []>} : vector<8x8xbf16>, vector<8x32xbf16>, vector<8x32xf32> -> vector<8x32xf32>
    %38 = arith.addf %14, %37 : vector<8x32xf32>
    %39 = vector.extract_strided_slice %8 {offsets = [0, 8], sizes = [8, 8], strides = [1, 1]} : vector<8x32xbf16> to vector<8x8xbf16>
    %40 = vector.shape_cast %39 : vector<8x8xbf16> to vector<1x8x8xbf16>
    %41 = vector.extract_strided_slice %10 {offsets = [0, 8], sizes = [8, 8], strides = [1, 1]} : vector<8x32xbf16> to vector<8x8xbf16>
    %42 = vector.shape_cast %41 : vector<8x8xbf16> to vector<1x8x8xbf16>
    %43 = vector.extract_strided_slice %12 {offsets = [0, 8], sizes = [8, 8], strides = [1, 1]} : vector<8x32xbf16> to vector<8x8xbf16>
    %44 = vector.shape_cast %43 : vector<8x8xbf16> to vector<1x8x8xbf16>
    %cst_13 = arith.constant dense<0.000000e+00> : vector<1x8x8xf32>
    %45 = tpu.matmul %40, %42, %cst_13 {dimension_numbers = #tpu.dot_dimension_numbers<[2], [2], [1], [1], [0, 0, 0, 1, 1, 1], [0], [0]>} : vector<1x8x8xbf16>, vector<1x8x8xbf16>, vector<1x8x8xf32> -> vector<1x8x8xf32>
    %cst_14 = arith.constant dense<0xFF800000> : vector<1x8xf32>
    %46 = vector.multi_reduction <maximumf>, %45, %cst_14 [2] : vector<1x8x8xf32> to vector<1x8xf32>
    %47 = vector.shape_cast %46 : vector<1x8xf32> to vector<1x8x1xf32>
    %48 = vector.broadcast %47 : vector<1x8x1xf32> to vector<1x8x8xf32>
    %49 = arith.subf %45, %48 : vector<1x8x8xf32>
    %50 = math.exp %49 : vector<1x8x8xf32>
    %cst_15 = arith.constant dense<0.000000e+00> : vector<1x8xf32>
    %51 = vector.multi_reduction <add>, %50, %cst_15 [2] : vector<1x8x8xf32> to vector<1x8xf32>
    %52 = vector.shape_cast %51 : vector<1x8xf32> to vector<1x8x1xf32>
    %53 = arith.truncf %50 : vector<1x8x8xf32> to vector<1x8x8xbf16>
    %cst_16 = arith.constant dense<0.000000e+00> : vector<1x8x8xf32>
    %54 = tpu.matmul %53, %44, %cst_16 {dimension_numbers = #tpu.dot_dimension_numbers<[2], [1], [1], [2], [0, 0, 0, 1, 1, 2], [0], [0]>} : vector<1x8x8xbf16>, vector<1x8x8xbf16>, vector<1x8x8xf32> -> vector<1x8x8xf32>
    %55 = tpu.reciprocal %52 {approx = true} : vector<1x8x1xf32> -> vector<1x8x1xf32>
    %56 = vector.broadcast %55 : vector<1x8x1xf32> to vector<1x8x8xf32>
    %57 = arith.mulf %54, %56 : vector<1x8x8xf32>
    %58 = vector.shape_cast %57 : vector<1x8x8xf32> to vector<8x8xf32>
    %59 = arith.truncf %58 : vector<8x8xf32> to vector<8x8xbf16>
    %60 = vector.extract_strided_slice %13 {offsets = [8, 0], sizes = [8, 32], strides = [1, 1]} : vector<32x32xbf16> to vector<8x32xbf16>
    %cst_17 = arith.constant dense<0.000000e+00> : vector<8x32xf32>
    %61 = tpu.matmul %59, %60, %cst_17 {dimension_numbers = #tpu.dot_dimension_numbers<[1], [0], [0], [1], [0, 0, 1, 1], [], []>} : vector<8x8xbf16>, vector<8x32xbf16>, vector<8x32xf32> -> vector<8x32xf32>
    %62 = arith.addf %38, %61 : vector<8x32xf32>
    %63 = vector.extract_strided_slice %8 {offsets = [0, 16], sizes = [8, 8], strides = [1, 1]} : vector<8x32xbf16> to vector<8x8xbf16>
    %64 = vector.shape_cast %63 : vector<8x8xbf16> to vector<1x8x8xbf16>
    %65 = vector.extract_strided_slice %10 {offsets = [0, 16], sizes = [8, 8], strides = [1, 1]} : vector<8x32xbf16> to vector<8x8xbf16>
    %66 = vector.shape_cast %65 : vector<8x8xbf16> to vector<1x8x8xbf16>
    %67 = vector.extract_strided_slice %12 {offsets = [0, 16], sizes = [8, 8], strides = [1, 1]} : vector<8x32xbf16> to vector<8x8xbf16>
    %68 = vector.shape_cast %67 : vector<8x8xbf16> to vector<1x8x8xbf16>
    %cst_18 = arith.constant dense<0.000000e+00> : vector<1x8x8xf32>
    %69 = tpu.matmul %64, %66, %cst_18 {dimension_numbers = #tpu.dot_dimension_numbers<[2], [2], [1], [1], [0, 0, 0, 1, 1, 1], [0], [0]>} : vector<1x8x8xbf16>, vector<1x8x8xbf16>, vector<1x8x8xf32> -> vector<1x8x8xf32>
    %cst_19 = arith.constant dense<0xFF800000> : vector<1x8xf32>
    %70 = vector.multi_reduction <maximumf>, %69, %cst_19 [2] : vector<1x8x8xf32> to vector<1x8xf32>
    %71 = vector.shape_cast %70 : vector<1x8xf32> to vector<1x8x1xf32>
    %72 = vector.broadcast %71 : vector<1x8x1xf32> to vector<1x8x8xf32>
    %73 = arith.subf %69, %72 : vector<1x8x8xf32>
    %74 = math.exp %73 : vector<1x8x8xf32>
    %cst_20 = arith.constant dense<0.000000e+00> : vector<1x8xf32>
    %75 = vector.multi_reduction <add>, %74, %cst_20 [2] : vector<1x8x8xf32> to vector<1x8xf32>
    %76 = vector.shape_cast %75 : vector<1x8xf32> to vector<1x8x1xf32>
    %77 = arith.truncf %74 : vector<1x8x8xf32> to vector<1x8x8xbf16>
    %cst_21 = arith.constant dense<0.000000e+00> : vector<1x8x8xf32>
    %78 = tpu.matmul %77, %68, %cst_21 {dimension_numbers = #tpu.dot_dimension_numbers<[2], [1], [1], [2], [0, 0, 0, 1, 1, 2], [0], [0]>} : vector<1x8x8xbf16>, vector<1x8x8xbf16>, vector<1x8x8xf32> -> vector<1x8x8xf32>
    %79 = tpu.reciprocal %76 {approx = true} : vector<1x8x1xf32> -> vector<1x8x1xf32>
    %80 = vector.broadcast %79 : vector<1x8x1xf32> to vector<1x8x8xf32>
    %81 = arith.mulf %78, %80 : vector<1x8x8xf32>
    %82 = vector.shape_cast %81 : vector<1x8x8xf32> to vector<8x8xf32>
    %83 = arith.truncf %82 : vector<8x8xf32> to vector<8x8xbf16>
    %84 = vector.extract_strided_slice %13 {offsets = [16, 0], sizes = [8, 32], strides = [1, 1]} : vector<32x32xbf16> to vector<8x32xbf16>
    %cst_22 = arith.constant dense<0.000000e+00> : vector<8x32xf32>
    %85 = tpu.matmul %83, %84, %cst_22 {dimension_numbers = #tpu.dot_dimension_numbers<[1], [0], [0], [1], [0, 0, 1, 1], [], []>} : vector<8x8xbf16>, vector<8x32xbf16>, vector<8x32xf32> -> vector<8x32xf32>
    %86 = arith.addf %62, %85 : vector<8x32xf32>
    %87 = vector.extract_strided_slice %8 {offsets = [0, 24], sizes = [8, 8], strides = [1, 1]} : vector<8x32xbf16> to vector<8x8xbf16>
    %88 = vector.shape_cast %87 : vector<8x8xbf16> to vector<1x8x8xbf16>
    %89 = vector.extract_strided_slice %10 {offsets = [0, 24], sizes = [8, 8], strides = [1, 1]} : vector<8x32xbf16> to vector<8x8xbf16>
    %90 = vector.shape_cast %89 : vector<8x8xbf16> to vector<1x8x8xbf16>
    %91 = vector.extract_strided_slice %12 {offsets = [0, 24], sizes = [8, 8], strides = [1, 1]} : vector<8x32xbf16> to vector<8x8xbf16>
    %92 = vector.shape_cast %91 : vector<8x8xbf16> to vector<1x8x8xbf16>
    %cst_23 = arith.constant dense<0.000000e+00> : vector<1x8x8xf32>
    %93 = tpu.matmul %88, %90, %cst_23 {dimension_numbers = #tpu.dot_dimension_numbers<[2], [2], [1], [1], [0, 0, 0, 1, 1, 1], [0], [0]>} : vector<1x8x8xbf16>, vector<1x8x8xbf16>, vector<1x8x8xf32> -> vector<1x8x8xf32>
    %cst_24 = arith.constant dense<0xFF800000> : vector<1x8xf32>
    %94 = vector.multi_reduction <maximumf>, %93, %cst_24 [2] : vector<1x8x8xf32> to vector<1x8xf32>
    %95 = vector.shape_cast %94 : vector<1x8xf32> to vector<1x8x1xf32>
    %96 = vector.broadcast %95 : vector<1x8x1xf32> to vector<1x8x8xf32>
    %97 = arith.subf %93, %96 : vector<1x8x8xf32>
    %98 = math.exp %97 : vector<1x8x8xf32>
    %cst_25 = arith.constant dense<0.000000e+00> : vector<1x8xf32>
    %99 = vector.multi_reduction <add>, %98, %cst_25 [2] : vector<1x8x8xf32> to vector<1x8xf32>
    %100 = vector.shape_cast %99 : vector<1x8xf32> to vector<1x8x1xf32>
    %101 = arith.truncf %98 : vector<1x8x8xf32> to vector<1x8x8xbf16>
    %cst_26 = arith.constant dense<0.000000e+00> : vector<1x8x8xf32>
    %102 = tpu.matmul %101, %92, %cst_26 {dimension_numbers = #tpu.dot_dimension_numbers<[2], [1], [1], [2], [0, 0, 0, 1, 1, 2], [0], [0]>} : vector<1x8x8xbf16>, vector<1x8x8xbf16>, vector<1x8x8xf32> -> vector<1x8x8xf32>
    %103 = tpu.reciprocal %100 {approx = true} : vector<1x8x1xf32> -> vector<1x8x1xf32>
    %104 = vector.broadcast %103 : vector<1x8x1xf32> to vector<1x8x8xf32>
    %105 = arith.mulf %102, %104 : vector<1x8x8xf32>
    %106 = vector.shape_cast %105 : vector<1x8x8xf32> to vector<8x8xf32>
    %107 = arith.truncf %106 : vector<8x8xf32> to vector<8x8xbf16>
    %108 = vector.extract_strided_slice %13 {offsets = [24, 0], sizes = [8, 32], strides = [1, 1]} : vector<32x32xbf16> to vector<8x32xbf16>
    %cst_27 = arith.constant dense<0.000000e+00> : vector<8x32xf32>
    %109 = tpu.matmul %107, %108, %cst_27 {dimension_numbers = #tpu.dot_dimension_numbers<[1], [0], [0], [1], [0, 0, 1, 1], [], []>} : vector<8x8xbf16>, vector<8x32xbf16>, vector<8x32xf32> -> vector<8x32xf32>
    %110 = arith.addf %86, %109 : vector<8x32xf32>
    %c0_28 = arith.constant 0 : index
    %c0_29 = arith.constant 0 : index
    %111 = vector.load %arg5[%c0_28, %c0_29] : memref<1x32xf32, #tpu.memory_space<vmem>>, vector<1x32xf32>
    %112 = vector.broadcast %111 : vector<1x32xf32> to vector<8x32xf32>
    %113 = arith.addf %110, %112 : vector<8x32xf32>
    %114 = arith.addf %113, %0 : vector<8x32xf32>
    %115 = arith.truncf %114 : vector<8x32xf32> to vector<8x32xbf16>
    %c0_30 = arith.constant 0 : index
    %c0_31 = arith.constant 0 : index
    %116 = vector.load %arg6[%c0_30, %c0_31] : memref<32x32xbf16, #tpu.memory_space<vmem>>, vector<32x32xbf16>
    %cst_32 = arith.constant dense<0.000000e+00> : vector<8x32xf32>
    %117 = tpu.matmul %115, %116, %cst_32 {dimension_numbers = #tpu.dot_dimension_numbers<[1], [0], [0], [1], [0, 0, 1, 1], [], []>} : vector<8x32xbf16>, vector<32x32xbf16>, vector<8x32xf32> -> vector<8x32xf32>
    %118 = arith.addf %117, %114 : vector<8x32xf32>
    %c0_33 = arith.constant 0 : index
    %c0_34 = arith.constant 0 : index
    %119 = vector.load %arg7[%c0_33, %c0_34] : memref<8x32xf32, #tpu.memory_space<vmem>>, vector<8x32xf32>
    tpu.vector_store %arg7[%c0_33, %c0_34], %118 {strides = array<i32>} : memref<8x32xf32, #tpu.memory_space<vmem>>, vector<8x32xf32>,
    return
  }
  func.func @transform_0(%arg0: i32) -> (i32, i32) {
    %c0_i32 = arith.constant 0 : i32
    %c0_i32_0 = arith.constant 0 : i32
    return %arg0, %c0_i32 : i32, i32
  }
  func.func @transform_1(%arg0: i32) -> (i32, i32) {
    %c0_i32 = arith.constant 0 : i32
    %c0_i32_0 = arith.constant 0 : i32
    %c0_i32_1 = arith.constant 0 : i32
    return %c0_i32, %c0_i32_0 : i32, i32
  }
  func.func @transform_2(%arg0: i32) -> (i32, i32) {
    %c0_i32 = arith.constant 0 : i32
    %c0_i32_0 = arith.constant 0 : i32
    %c0_i32_1 = arith.constant 0 : i32
    return %c0_i32, %c0_i32_0 : i32, i32
  }
  func.func @transform_3(%arg0: i32) -> (i32, i32) {
    %c0_i32 = arith.constant 0 : i32
    %c0_i32_0 = arith.constant 0 : i32
    %c0_i32_1 = arith.constant 0 : i32
    return %c0_i32, %c0_i32_0 : i32, i32
  }
  func.func @transform_4(%arg0: i32) -> (i32, i32) {
    %c0_i32 = arith.constant 0 : i32
    %c0_i32_0 = arith.constant 0 : i32
    %c0_i32_1 = arith.constant 0 : i32
    return %c0_i32, %c0_i32_0 : i32, i32
  }
  func.func @transform_5(%arg0: i32) -> (i32, i32) {
    %c0_i32 = arith.constant 0 : i32
    %c0_i32_0 = arith.constant 0 : i32
    %c0_i32_1 = arith.constant 0 : i32
    return %c0_i32, %c0_i32_0 : i32, i32
  }
  func.func @transform_6(%arg0: i32) -> (i32, i32) {
    %c0_i32 = arith.constant 0 : i32
    %c0_i32_0 = arith.constant 0 : i32
    return %arg0, %c0_i32 : i32, i32
  }
}

module attributes {stable_mosaic.version = 11 : i64} {
  func.func @_transformer_layer_kernel(%arg0: i32, %arg1: memref<8x32xf32, #tpu.memory_space<vmem>>, %arg2: memref<32x96xbf16, #tpu.memory_space<vmem>>, %arg3: memref<1x96xf32, #tpu.memory_space<vmem>>, %arg4: memref<32x32xbf16, #tpu.memory_space<vmem>>, %arg5: memref<1x32xf32, #tpu.memory_space<vmem>>, %arg6: memref<32x32xbf16, #tpu.memory_space<vmem>>, %arg7: memref<8x32xf32, #tpu.memory_space<vmem>>) attributes {dimension_semantics = [#tpu.dimension_semantics<parallel>], iteration_bounds = array<i64: 2>, scalar_prefetch = 0 : i64, scratch_operands = 0 : i64, tpu.core_type = #tpu.core_type<tc>, window_params = [{transform_indices = @transform_0, window_bounds = array<i64: 8, 32>}, {pipeline_mode = #tpu.pipeline_mode<synchronous>, transform_indices = @transform_1, window_bounds = array<i64: 32, 96>}, {pipeline_mode = #tpu.pipeline_mode<synchronous>, transform_indices = @transform_2, window_bounds = array<i64: 1, 96>}, {pipeline_mode = #tpu.pipeline_mode<synchronous>, transform_indices = @transform_3, window_bounds = array<i64: 32, 32>}, {pipeline_mode = #tpu.pipeline_mode<synchronous>, transform_indices = @transform_4, window_bounds = array<i64: 1, 32>}, {pipeline_mode = #tpu.pipeline_mode<synchronous>, transform_indices = @transform_5, window_bounds = array<i64: 32, 32>}, {transform_indices = @transform_6, window_bounds = array<i64: 8, 32>}]} {
    %c0 = arith.constant 0 : index
    %c0_0 = arith.constant 0 : index
    %0 = vector.load %arg1[%c0, %c0_0] : memref<8x32xf32, #tpu.memory_space<vmem>>, vector<8x32xf32>
    %1 = arith.truncf %0 : vector<8x32xf32> to vector<8x32xbf16>
    %c0_1 = arith.constant 0 : index
    %c0_2 = arith.constant 0 : index
    %2 = vector.load %arg2[%c0_1, %c0_2] : memref<32x96xbf16, #tpu.memory_space<vmem>>, vector<32x96xbf16>
    %cst = arith.constant dense<0.000000e+00> : vector<8x96xf32>
    %3 = tpu.matmul %1, %2, %cst {dimension_numbers = #tpu.dot_dimension_numbers<[1], [0], [0], [1], [0, 0, 1, 1], [], []>} : vector<8x32xbf16>, vector<32x96xbf16>, vector<8x96xf32> -> vector<8x96xf32>
    %c0_3 = arith.constant 0 : index
    %c0_4 = arith.constant 0 : index
    %4 = vector.load %arg3[%c0_3, %c0_4] : memref<1x96xf32, #tpu.memory_space<vmem>>, vector<1x96xf32>
    %5 = vector.broadcast %4 : vector<1x96xf32> to vector<8x96xf32>
    %6 = arith.addf %3, %5 : vector<8x96xf32>
    %7 = vector.extract_strided_slice %6 {offsets = [0, 0], sizes = [8, 32], strides = [1, 1]} : vector<8x96xf32> to vector<8x32xf32>
    %8 = arith.truncf %7 : vector<8x32xf32> to vector<8x32xbf16>
    %9 = vector.extract_strided_slice %6 {offsets = [0, 32], sizes = [8, 32], strides = [1, 1]} : vector<8x96xf32> to vector<8x32xf32>
    %10 = arith.truncf %9 : vector<8x32xf32> to vector<8x32xbf16>
    %11 = vector.extract_strided_slice %6 {offsets = [0, 64], sizes = [8, 32], strides = [1, 1]} : vector<8x96xf32> to vector<8x32xf32>
    %12 = arith.truncf %11 : vector<8x32xf32> to vector<8x32xbf16>
    %c0_5 = arith.constant 0 : index
    %c0_6 = arith.constant 0 : index
    %13 = vector.load %arg4[%c0_5, %c0_6] : memref<32x32xbf16, #tpu.memory_space<vmem>>, vector<32x32xbf16>
    %cst_7 = arith.constant 0.000000e+00 : f32
    %14 = vector.broadcast %cst_7 : f32 to vector<8x32xf32>
    %15 = vector.extract_strided_slice %8 {offsets = [0, 0], sizes = [8, 8], strides = [1, 1]} : vector<8x32xbf16> to vector<8x8xbf16>
    %16 = vector.shape_cast %15 : vector<8x8xbf16> to vector<1x8x8xbf16>
    %17 = vector.extract_strided_slice %10 {offsets = [0, 0], sizes = [8, 8], strides = [1, 1]} : vector<8x32xbf16> to vector<8x8xbf16>
    %18 = vector.shape_cast %17 : vector<8x8xbf16> to vector<1x8x8xbf16>
    %19 = vector.extract_strided_slice %12 {offsets = [0, 0], sizes = [8, 8], strides = [1, 1]} : vector<8x32xbf16> to vector<8x8xbf16>
    %20 = vector.shape_cast %19 : vector<8x8xbf16> to vector<1x8x8xbf16>
    %cst_8 = arith.constant dense<0.000000e+00> : vector<1x8x8xf32>
    %21 = tpu.matmul %16, %18, %cst_8 {dimension_numbers = #tpu.dot_dimension_numbers<[2], [2], [1], [1], [0, 0, 0, 1, 1, 1], [0], [0]>} : vector<1x8x8xbf16>, vector<1x8x8xbf16>, vector<1x8x8xf32> -> vector<1x8x8xf32>
    %cst_9 = arith.constant dense<0xFF800000> : vector<1x8xf32>
    %22 = vector.multi_reduction <maximumf>, %21, %cst_9 [2] : vector<1x8x8xf32> to vector<1x8xf32>
    %23 = vector.shape_cast %22 : vector<1x8xf32> to vector<1x8x1xf32>
    %24 = vector.broadcast %23 : vector<1x8x1xf32> to vector<1x8x8xf32>
    %25 = arith.subf %21, %24 : vector<1x8x8xf32>
    %26 = math.exp %25 : vector<1x8x8xf32>
    %cst_10 = arith.constant dense<0.000000e+00> : vector<1x8xf32>
    %27 = vector.multi_reduction <add>, %26, %cst_10 [2] : vector<1x8x8xf32> to vector<1x8xf32>
    %28 = vector.shape_cast %27 : vector<1x8xf32> to vector<1x8x1xf32>
    %29 = arith.truncf %26 : vector<1x8x8xf32> to vector<1x8x8xbf16>
    %cst_11 = arith.constant dense<0.000000e+00> : vector<1x8x8xf32>
    %30 = tpu.matmul %29, %20, %cst_11 {dimension_numbers = #tpu.dot_dimension_numbers<[2], [1], [1], [2], [0, 0, 0, 1, 1, 2], [0], [0]>} : vector<1x8x8xbf16>, vector<1x8x8xbf16>, vector<1x8x8xf32> -> vector<1x8x8xf32>
    %31 = tpu.reciprocal %28 {approx = true} : vector<1x8x1xf32> -> vector<1x8x1xf32>
    %32 = vector.broadcast %31 : vector<1x8x1xf32> to vector<1x8x8xf32>
    %33 = arith.mulf %30, %32 : vector<1x8x8xf32>
    %34 = vector.shape_cast %33 : vector<1x8x8xf32> to vector<8x8xf32>
    %35 = arith.truncf %34 : vector<8x8xf32> to vector<8x8xbf16>
    %36 = vector.extract_strided_slice %13 {offsets = [0, 0], sizes = [8, 32], strides = [1, 1]} : vector<32x32xbf16> to vector<8x32xbf16>
    %cst_12 = arith.constant dense<0.000000e+00> : vector<8x32xf32>
    %37 = tpu.matmul %35, %36, %cst_12 {dimension_numbers = #tpu.dot_dimension_numbers<[1], [0], [0], [1], [0, 0, 1, 1], [], []>} : vector<8x8xbf16>, vector<8x32xbf16>, vector<8x32xf32> -> vector<8x32xf32>
    %38 = arith.addf %14, %37 : vector<8x32xf32>
    %39 = vector.extract_strided_slice %8 {offsets = [0, 8], sizes = [8, 8], strides = [1, 1]} : vector<8x32xbf16> to vector<8x8xbf16>
    %40 = vector.shape_cast %39 : vector<8x8xbf16> to vector<1x8x8xbf16>
    %41 = vector.extract_strided_slice %10 {offsets = [0, 8], sizes = [8, 8], strides = [1, 1]} : vector<8x32xbf16> to vector<8x8xbf16>
    %42 = vector.shape_cast %41 : vector<8x8xbf16> to vector<1x8x8xbf16>
    %43 = vector.extract_strided_slice %12 {offsets = [0, 8], sizes = [8, 8], strides = [1, 1]} : vector<8x32xbf16> to vector<8x8xbf16>
    %44 = vector.shape_cast %43 : vector<8x8xbf16> to vector<1x8x8xbf16>
    %cst_13 = arith.constant dense<0.000000e+00> : vector<1x8x8xf32>
    %45 = tpu.matmul %40, %42, %cst_13 {dimension_numbers = #tpu.dot_dimension_numbers<[2], [2], [1], [1], [0, 0, 0, 1, 1, 1], [0], [0]>} : vector<1x8x8xbf16>, vector<1x8x8xbf16>, vector<1x8x8xf32> -> vector<1x8x8xf32>
    %cst_14 = arith.constant dense<0xFF800000> : vector<1x8xf32>
    %46 = vector.multi_reduction <maximumf>, %45, %cst_14 [2] : vector<1x8x8xf32> to vector<1x8xf32>
    %47 = vector.shape_cast %46 : vector<1x8xf32> to vector<1x8x1xf32>
    %48 = vector.broadcast %47 : vector<1x8x1xf32> to vector<1x8x8xf32>
    %49 = arith.subf %45, %48 : vector<1x8x8xf32>
    %50 = math.exp %49 : vector<1x8x8xf32>
    %cst_15 = arith.constant dense<0.000000e+00> : vector<1x8xf32>
    %51 = vector.multi_reduction <add>, %50, %cst_15 [2] : vector<1x8x8xf32> to vector<1x8xf32>
    %52 = vector.shape_cast %51 : vector<1x8xf32> to vector<1x8x1xf32>
    %53 = arith.truncf %50 : vector<1x8x8xf32> to vector<1x8x8xbf16>
    %cst_16 = arith.constant dense<0.000000e+00> : vector<1x8x8xf32>
    %54 = tpu.matmul %53, %44, %cst_16 {dimension_numbers = #tpu.dot_dimension_numbers<[2], [1], [1], [2], [0, 0, 0, 1, 1, 2], [0], [0]>} : vector<1x8x8xbf16>, vector<1x8x8xbf16>, vector<1x8x8xf32> -> vector<1x8x8xf32>
    %55 = tpu.reciprocal %52 {approx = true} : vector<1x8x1xf32> -> vector<1x8x1xf32>
    %56 = vector.broadcast %55 : vector<1x8x1xf32> to vector<1x8x8xf32>
    %57 = arith.mulf %54, %56 : vector<1x8x8xf32>
    %58 = vector.shape_cast %57 : vector<1x8x8xf32> to vector<8x8xf32>
    %59 = arith.truncf %58 : vector<8x8xf32> to vector<8x8xbf16>
    %60 = vector.extract_strided_slice %13 {offsets = [8, 0], sizes = [8, 32], strides = [1, 1]} : vector<32x32xbf16> to vector<8x32xbf16>
    %cst_17 = arith.constant dense<0.000000e+00> : vector<8x32xf32>
    %61 = tpu.matmul %59, %60, %cst_17 {dimension_numbers = #tpu.dot_dimension_numbers<[1], [0], [0], [1], [0, 0, 1, 1], [], []>} : vector<8x8xbf16>, vector<8x32xbf16>, vector<8x32xf32> -> vector<8x32xf32>
    %62 = arith.addf %38, %61 : vector<8x32xf32>
    %63 = vector.extract_strided_slice %8 {offsets = [0, 16], sizes = [8, 8], strides = [1, 1]} : vector<8x32xbf16> to vector<8x8xbf16>
    %64 = vector.shape_cast %63 : vector<8x8xbf16> to vector<1x8x8xbf16>
    %65 = vector.extract_strided_slice %10 {offsets = [0, 16], sizes = [8, 8], strides = [1, 1]} : vector<8x32xbf16> to vector<8x8xbf16>
    %66 = vector.shape_cast %65 : vector<8x8xbf16> to vector<1x8x8xbf16>
    %67 = vector.extract_strided_slice %12 {offsets = [0, 16], sizes = [8, 8], strides = [1, 1]} : vector<8x32xbf16> to vector<8x8xbf16>
    %68 = vector.shape_cast %67 : vector<8x8xbf16> to vector<1x8x8xbf16>
    %cst_18 = arith.constant dense<0.000000e+00> : vector<1x8x8xf32>
    %69 = tpu.matmul %64, %66, %cst_18 {dimension_numbers = #tpu.dot_dimension_numbers<[2], [2], [1], [1], [0, 0, 0, 1, 1, 1], [0], [0]>} : vector<1x8x8xbf16>, vector<1x8x8xbf16>, vector<1x8x8xf32> -> vector<1x8x8xf32>
    %cst_19 = arith.constant dense<0xFF800000> : vector<1x8xf32>
    %70 = vector.multi_reduction <maximumf>, %69, %cst_19 [2] : vector<1x8x8xf32> to vector<1x8xf32>
    %71 = vector.shape_cast %70 : vector<1x8xf32> to vector<1x8x1xf32>
    %72 = vector.broadcast %71 : vector<1x8x1xf32> to vector<1x8x8xf32>
    %73 = arith.subf %69, %72 : vector<1x8x8xf32>
    %74 = math.exp %73 : vector<1x8x8xf32>
    %cst_20 = arith.constant dense<0.000000e+00> : vector<1x8xf32>
    %75 = vector.multi_reduction <add>, %74, %cst_20 [2] : vector<1x8x8xf32> to vector<1x8xf32>
    %76 = vector.shape_cast %75 : vector<1x8xf32> to vector<1x8x1xf32>
    %77 = arith.truncf %74 : vector<1x8x8xf32> to vector<1x8x8xbf16>
    %cst_21 = arith.constant dense<0.000000e+00> : vector<1x8x8xf32>
    %78 = tpu.matmul %77, %68, %cst_21 {dimension_numbers = #tpu.dot_dimension_numbers<[2], [1], [1], [2], [0, 0, 0, 1, 1, 2], [0], [0]>} : vector<1x8x8xbf16>, vector<1x8x8xbf16>, vector<1x8x8xf32> -> vector<1x8x8xf32>
    %79 = tpu.reciprocal %76 {approx = true} : vector<1x8x1xf32> -> vector<1x8x1xf32>
    %80 = vector.broadcast %79 : vector<1x8x1xf32> to vector<1x8x8xf32>
    %81 = arith.mulf %78, %80 : vector<1x8x8xf32>
    %82 = vector.shape_cast %81 : vector<1x8x8xf32> to vector<8x8xf32>
    %83 = arith.truncf %82 : vector<8x8xf32> to vector<8x8xbf16>
    %84 = vector.extract_strided_slice %13 {offsets = [16, 0], sizes = [8, 32], strides = [1, 1]} : vector<32x32xbf16> to vector<8x32xbf16>
    %cst_22 = arith.constant dense<0.000000e+00> : vector<8x32xf32>
    %85 = tpu.matmul %83, %84, %cst_22 {dimension_numbers = #tpu.dot_dimension_numbers<[1], [0], [0], [1], [0, 0, 1, 1], [], []>} : vector<8x8xbf16>, vector<8x32xbf16>, vector<8x32xf32> -> vector<8x32xf32>
    %86 = arith.addf %62, %85 : vector<8x32xf32>
    %87 = vector.extract_strided_slice %8 {offsets = [0, 24], sizes = [8, 8], strides = [1, 1]} : vector<8x32xbf16> to vector<8x8xbf16>
    %88 = vector.shape_cast %87 : vector<8x8xbf16> to vector<1x8x8xbf16>
    %89 = vector.extract_strided_slice %10 {offsets = [0, 24], sizes = [8, 8], strides = [1, 1]} : vector<8x32xbf16> to vector<8x8xbf16>
    %90 = vector.shape_cast %89 : vector<8x8xbf16> to vector<1x8x8xbf16>
    %91 = vector.extract_strided_slice %12 {offsets = [0, 24], sizes = [8, 8], strides = [1, 1]} : vector<8x32xbf16> to vector<8x8xbf16>
    %92 = vector.shape_cast %91 : vector<8x8xbf16> to vector<1x8x8xbf16>
    %cst_23 = arith.constant dense<0.000000e+00> : vector<1x8x8xf32>
    %93 = tpu.matmul %88, %90, %cst_23 {dimension_numbers = #tpu.dot_dimension_numbers<[2], [2], [1], [1], [0, 0, 0, 1, 1, 1], [0], [0]>} : vector<1x8x8xbf16>, vector<1x8x8xbf16>, vector<1x8x8xf32> -> vector<1x8x8xf32>
    %cst_24 = arith.constant dense<0xFF800000> : vector<1x8xf32>
    %94 = vector.multi_reduction <maximumf>, %93, %cst_24 [2] : vector<1x8x8xf32> to vector<1x8xf32>
    %95 = vector.shape_cast %94 : vector<1x8xf32> to vector<1x8x1xf32>
    %96 = vector.broadcast %95 : vector<1x8x1xf32> to vector<1x8x8xf32>
    %97 = arith.subf %93, %96 : vector<1x8x8xf32>
    %98 = math.exp %97 : vector<1x8x8xf32>
    %cst_25 = arith.constant dense<0.000000e+00> : vector<1x8xf32>
    %99 = vector.multi_reduction <add>, %98, %cst_25 [2] : vector<1x8x8xf32> to vector<1x8xf32>
    %100 = vector.shape_cast %99 : vector<1x8xf32> to vector<1x8x1xf32>
    %101 = arith.truncf %98 : vector<1x8x8xf32> to vector<1x8x8xbf16>
    %cst_26 = arith.constant dense<0.000000e+00> : vector<1x8x8xf32>
    %102 = tpu.matmul %101, %92, %cst_26 {dimension_numbers = #tpu.dot_dimension_numbers<[2], [1], [1], [2], [0, 0, 0, 1, 1, 2], [0], [0]>} : vector<1x8x8xbf16>, vector<1x8x8xbf16>, vector<1x8x8xf32> -> vector<1x8x8xf32>
    %103 = tpu.reciprocal %100 {approx = true} : vector<1x8x1xf32> -> vector<1x8x1xf32>
    %104 = vector.broadcast %103 : vector<1x8x1xf32> to vector<1x8x8xf32>
    %105 = arith.mulf %102, %104 : vector<1x8x8xf32>
    %106 = vector.shape_cast %105 : vector<1x8x8xf32> to vector<8x8xf32>
    %107 = arith.truncf %106 : vector<8x8xf32> to vector<8x8xbf16>
    %108 = vector.extract_strided_slice %13 {offsets = [24, 0], sizes = [8, 32], strides = [1, 1]} : vector<32x32xbf16> to vector<8x32xbf16>
    %cst_27 = arith.constant dense<0.000000e+00> : vector<8x32xf32>
    %109 = tpu.matmul %107, %108, %cst_27 {dimension_numbers = #tpu.dot_dimension_numbers<[1], [0], [0], [1], [0, 0, 1, 1], [], []>} : vector<8x8xbf16>, vector<8x32xbf16>, vector<8x32xf32> -> vector<8x32xf32>
    %110 = arith.addf %86, %109 : vector<8x32xf32>
    %c0_28 = arith.constant 0 : index
    %c0_29 = arith.constant 0 : index
    %111 = vector.load %arg5[%c0_28, %c0_29] : memref<1x32xf32, #tpu.memory_space<vmem>>, vector<1x32xf32>
    %112 = vector.broadcast %111 : vector<1x32xf32> to vector<8x32xf32>
    %113 = arith.addf %110, %112 : vector<8x32xf32>
    %114 = arith.addf %113, %0 : vector<8x32xf32>
    %115 = arith.truncf %114 : vector<8x32xf32> to vector<8x32xbf16>
    %c0_30 = arith.constant 0 : index
    %c0_31 = arith.constant 0 : index
    %116 = vector.load %arg6[%c0_30, %c0_31] : memref<32x32xbf16, #tpu.memory_space<vmem>>, vector<32x32xbf16>
    %cst_32 = arith.constant dense<0.000000e+00> : vector<8x32xf32>
    %117 = tpu.matmul %115, %116, %cst_32 {dimension_numbers = #tpu.dot_dimension_numbers<[1], [0], [0], [1], [0, 0, 1, 1], [], []>} : vector<8x32xbf16>, vector<32x32xbf16>, vector<8x32xf32> -> vector<8x32xf32>
    %118 = arith.addf %117, %114 : vector<8x32xf32>
    %c0_33 = arith.constant 0 : index
    %c0_34 = arith.constant 0 : index
    %119 = vector.load %arg7[%c0_33, %c0_34] : memref<8x32xf32, #tpu.memory_space<vmem>>, vector<8x32xf32>
    tpu.vector_store %arg7[%c0_33, %c0_34], %118 {strides = array<i32>} : memref<8x32xf32, #tpu.memory_space<vmem>>, vector<8x32xf32>,
    return
  }
  func.func @transform_0(%arg0: i32) -> (i32, i32) {
    %c0_i32 = arith.constant 0 : i32
    %c0_i32_0 = arith.constant 0 : i32
    return %arg0, %c0_i32 : i32, i32
  }
  func.func @transform_1(%arg0: i32) -> (i32, i32) {
    %c0_i32 = arith.constant 0 : i32
    %c0_i32_0 = arith.constant 0 : i32
    %c0_i32_1 = arith.constant 0 : i32
    return %c0_i32, %c0_i32_0 : i32, i32
  }
  func.func @transform_2(%arg0: i32) -> (i32, i32) {
    %c0_i32 = arith.constant 0 : i32
    %c0_i32_0 = arith.constant 0 : i32
    %c0_i32_1 = arith.constant 0 : i32
    return %c0_i32, %c0_i32_0 : i32, i32
  }
  func.func @transform_3(%arg0: i32) -> (i32, i32) {
    %c0_i32 = arith.constant 0 : i32
    %c0_i32_0 = arith.constant 0 : i32
    %c0_i32_1 = arith.constant 0 : i32
    return %c0_i32, %c0_i32_0 : i32, i32
  }
  func.func @transform_4(%arg0: i32) -> (i32, i32) {
    %c0_i32 = arith.constant 0 : i32
    %c0_i32_0 = arith.constant 0 : i32
    %c0_i32_1 = arith.constant 0 : i32
    return %c0_i32, %c0_i32_0 : i32, i32
  }
  func.func @transform_5(%arg0: i32) -> (i32, i32) {
    %c0_i32 = arith.constant 0 : i32
    %c0_i32_0 = arith.constant 0 : i32
    %c0_i32_1 = arith.constant 0 : i32
    return %c0_i32, %c0_i32_0 : i32, i32
  }
  func.func @transform_6(%arg0: i32) -> (i32, i32) {
    %c0_i32 = arith.constant 0 : i32
    %c0_i32_0 = arith.constant 0 : i32
    return %arg0, %c0_i32 : i32, i32
  }
}

</mosaic_0001>

<bundles_post_ra>
// kernel: tpu_custom_call.1
= control target key start
LH: loop header
LB: loop body
LE: loop exit
PB: predicated region body
PF: predicated region fallthrough
CT: control target
= control target key end

     0   :  { %11 = vsyncpa [#allocation3], 0  ;;  %s1989_s0 = inlined_call_operand.hbm [shape: f32[16,32], index: 0, kind: input, shape index: {}]   ;;  %s1990_s1 = inlined_call_operand.hbm [shape: bf16[32,96], index: 1, kind: input, shape index: {}]   ;;  %s1991_s2 = inlined_call_operand.vmem [shape: f32[1,96], index: 2, kind: input, shape index: {}]   ;;  %s1992_s3 = inlined_call_operand.hbm [shape: bf16[32,32], index: 3, kind: input, shape index: {}]   ;;  %s1993_s4 = inlined_call_operand.vmem [shape: f32[1,32], index: 4, kind: input, shape index: {}]   ;;  %s1994_s5 = inlined_call_operand.vmem [shape: bf16[32,32], index: 5, kind: input, shape index: {}]   ;;  %s1995_s6 = inlined_call_operand.hbm [shape: f32[16,32], index: 6, kind: output, shape index: {}]  }
   0x1   :  { %13 = vsyncpa [#allocation3 + $0x1], 0 }
   0x2   :  { %14 = vsyncpa [#allocation6], 0 }
   0x3   :  { %15 = vsyncpa [#allocation4], 0 }
   0x4   :  { %17 = vsyncpa [#allocation4 + $0x1], 0  ;;  %s1643_s21 = smov 0   ;;  %s1645_s22 = smov 0  }
   0x5   :  { %s1647_s23 = smov 0   ;;  %s1649_s24 = smov 0  }
   0x6 LB: > { %s1664_s25 = sadd.s32 4294967295, %s1587_s24   ;;  %s1175_s26 = sadd.s32 4294967294, %s1587_s24   ;;  %s1587_s24 = sphi %s1649_s24, %s2015_s24   ;;  %s1583_s23 = sphi %s1647_s23, %s2014_s23   ;;  %s1579_s22 = sphi %s1645_s22, %s2013_s22   ;;  %s1575_s21 = sphi %s1643_s21, %s2012_s21  }
   0x7   : > { %p43_p0 = scmp.ne.s32.totalorder %s1579_s22, %s1575_s21  ;;  %p1996_p1 = scmp.eq.s32.totalorder %s1664_s25, 0 }
   0x8   : > { %p178_p3 = scmp.eq.s32.totalorder %s1175_s26, 1  ;;  %p1176_p5 = scmp.ge.s32.totalorder %s1587_s24, 1 }
   0x9   : > { %p1673_p4 = por %p1996_p1, %p43_p0  ;;  %p185_p7 = scmp.lt.s32.totalorder %s1587_s24, 3 }
   0xa   : > { %p1678_p6 = por %p178_p3, %p43_p0  ;;  %s1589_s30 = smov [#allocation5]  }
   0xb   : > { %s1999_s27 = scalar_select %p1673_p4, 1, 0 }
   0xc   : > { %s2000_s28 = scalar_select %p1678_p6, 1, 0 }
   0xd   : > { %p1683_p8 = pnand %p1176_p5, %p185_p7  ;;  %s197_s7 = sshll.u32 %s1589_s30, 4  ;;  %s1687_s7 = int_to_ptr.vmem [resolvable:$true] %s197_s7 }
   0xe   : > { %s1590_s9 = smov [#allocation7]   ;;  %s1431_s13 = scalar_lea.hbm %s1990_s1, 256 }
   0xf   : > { %p1341_p9 = pneg %p1683_p8  ;;  %s213_s10 = sshll.u32 %s1590_s9, 4  ;;  %s1698_s10 = int_to_ptr.vmem [resolvable:$true] %s213_s10 }
  0x10   : > { %p1432_p12 = scmp.ne.s32.totalorder %s1990_s1, %s1431_s13  ;;  %p1438_p5 = scmp.lt.u32.totalorder %s1431_s13, %s1990_s1 }
  0x11   : > { %p1694_p11 = pnand %p1341_p9, %p1996_p1 }
  0x13   : > { %p1433_p13 = pneg %p1694_p11 }
  0x15   : > { %p1434_p0 = pnand %p1433_p13, %p1432_p12 }
  0x17   : > { %p1435_p3 = pneg %p1434_p0 }
  0x19   : > { %p1440_p7 = pnand %p1438_p5, %p1435_p3 }
  0x1b   : > { %1443 = shalt.err (!%p1440_p7)
}
  0x1c   : > { %s1444_s18 = scalar_lea.vmem %s1687_s7, 256  ;;  %p1452_p2 = scmp.lt.s32.totalorder %s1687_s7, %s1687_s7 }
  0x1d   : > { %p1445_p9 = scmp.ne.s32.totalorder %s1687_s7, %s1444_s18  ;;  %p1453_p12 = scmp.lt.s32.totalorder %s1444_s18, %s1444_s18 }
  0x1f   : > { %p1447_p10 = pnand %p1445_p9, %p1433_p13  ;;  %p1454_p0 = por %p1453_p12, %p1452_p2 }
  0x21   : > { %p1448_p1 = pneg %p1447_p10 }
  0x23   : > { %p1455_p6 = pnand %p1454_p0, %p1448_p1 }
  0x25   : > { %1458 = shalt.err (!%p1455_p6)
}
  0x26   : > { %s1591_s19 = smov 64   ;;  %s1592_s20 = smov 4  }
  0x27   : > { %1344 = dma.hbm_to_vmem [thread:$0]  (!%p1694_p11), %s1990_s1, 256, %s1687_s7, [#allocation6], %s1591_s19, %s1591_s19, %s1592_s20  }
  0x28   : > { %s1459_s12 = scalar_lea.hbm %s1992_s3, 256 }
  0x29   : > { %p1460_p2 = scmp.ne.s32.totalorder %s1992_s3, %s1459_s12  ;;  %p1466_p10 = scmp.lt.u32.totalorder %s1459_s12, %s1992_s3 }
  0x2b   : > { %p1462_p1 = pnand %p1460_p2, %p1433_p13 }
  0x2d   : > { %p1463_p6 = pneg %p1462_p1 }
  0x2f   : > { %p1468_p3 = pnand %p1466_p10, %p1463_p6 }
  0x31   : > { %1471 = shalt.err (!%p1468_p3)
}
  0x32   : > { %s1472_s7 = scalar_lea.vmem %s1698_s10, 256  ;;  %p1480_p12 = scmp.lt.s32.totalorder %s1698_s10, %s1698_s10 }
  0x33   : > { %p1473_p5 = scmp.ne.s32.totalorder %s1698_s10, %s1472_s7  ;;  %p1481_p0 = scmp.lt.s32.totalorder %s1472_s7, %s1472_s7 }
  0x35   : > { %p1475_p7 = pnand %p1473_p5, %p1433_p13  ;;  %p1482_p2 = por %p1481_p0, %p1480_p12 }
  0x37   : > { %p1476_p9 = pneg %p1475_p7 }
  0x39   : > { %p1483_p1 = pnand %p1482_p2, %p1476_p9 }
  0x3b   : > { %1486 = shalt.err (!%p1483_p1)
}
  0x3c   : > { %1347 = dma.hbm_to_vmem [thread:$0]  (!%p1694_p11), %s1992_s3, 256, %s1698_s10, [#allocation6], %s1591_s19, %s1591_s19, %s1592_s20  }
  0x3d   : > { %s1753_s26 = sadd.s32 1, %s1587_s24   ;;  %s30_s8 = sadd.s32 1, %s1583_s23 }
  0x3e   : > { %s27_s30 = ssub.s32 %s1587_s24, %s1753_s26  ;;  %p37_p13 = scmp.ne.s32.totalorder %s1583_s23, %s1579_s22 }
  0x3f   : > { %p28_p6 = scmp.eq.s32.totalorder %s27_s30, 0  ;;  %p38_p10 = scmp.eq.s32.totalorder %s1587_s24, 0 }
  0x40   : > { %p2003_p3 = scmp.eq.s32.totalorder %s1664_s25, 1  ;;  %p1358_p7 = scmp.lt.s32.totalorder %s1587_s24, 2 }
  0x41   : > { %s1769_s11 = scalar_select %p28_p6, %s1583_s23, %s30_s8  }
  0x42   : > { %p1763_p5 = por %p2003_p3, %p37_p13  ;;  %p39_p9 = por %p38_p10, %p37_p13 }
  0x43   : > { %s233_s12 = sand.u32 1, %s1583_s23   ;;  %s1181_s10 = sshll.u32 %s1587_s24, 7 }
  0x44   : > { %s2004_s9 = scalar_select %p1763_p5, 1, 0 }
  0x45   : > { %s1180_s13 = sshll.u32 %s233_s12, 3  ;;  %s1776_s14 = scalar_lea.hbm %s1989_s0, %s1181_s10 }
  0x46   : > { %s237_s15 = scalar_lea.vmem [#allocation2], %s1180_s13  ;;  %p1780_p11 = pnand %p1358_p7, %p39_p9 }
  0x47   : > { %s244_s16 = sshll.u32 %s237_s15, 4  ;;  %s234_s17 = scalar_lea.sflag [#allocation3], %s233_s12  ;;  %s1778_s16 = int_to_ptr.vmem [resolvable:$true] %s244_s16 }
  0x48   : > { %s1487_s18 = scalar_lea.hbm %s1776_s14, 128  ;;  %p1489_p0 = pneg %p1780_p11 }
  0x49   : > { %p1488_p12 = scmp.ne.s32.totalorder %s1776_s14, %s1487_s18  ;;  %s1492_s13 = scalar_lea.hbm %s1989_s0, 256 }
  0x4a   : > { %p1493_p13 = scmp.lt.u32.totalorder %s1776_s14, %s1989_s0  ;;  %p1494_p6 = scmp.lt.u32.totalorder %s1492_s13, %s1487_s18 }
  0x4b   : > { %p1490_p2 = pnand %p1489_p0, %p1488_p12  ;;  %p1496_p3 = scmp.lt.u32.totalorder %s1487_s18, %s1776_s14 }
  0x4c   : > { %p1495_p10 = por %p1494_p6, %p1493_p13 }
  0x4d   : > { %p1491_p1 = pneg %p1490_p2 }
  0x4e   : > { %p1497_p7 = por %p1496_p3, %p1495_p10 }
  0x50   : > { %p1498_p9 = pnand %p1497_p7, %p1491_p1 }
  0x52   : > { %1501 = shalt.err (!%p1498_p9)
}
  0x53   : > { %s1502_s12 = scalar_lea.vmem %s1778_s16, 128  ;;  %s1593_s20 = smov [#allocation2]  }
  0x54   : > { %p1503_p12 = scmp.ne.s32.totalorder %s1778_s16, %s1502_s12  ;;  %s1507_s15 = sshll.u32 %s1593_s20, 4  ;;  %s1508_s15 = int_to_ptr.vmem [resolvable:$false] %s1507_s15 }
  0x55   : > { %s1509_s8 = scalar_lea.vmem %s1508_s15, 256  ;;  %p1510_p4 = scmp.lt.s32.totalorder %s1778_s16, %s1508_s15 }
  0x56   : > { %p1505_p2 = pnand %p1503_p12, %p1489_p0  ;;  %p1511_p13 = scmp.lt.s32.totalorder %s1509_s8, %s1502_s12 }
  0x58   : > { %p1506_p5 = pneg %p1505_p2  ;;  %p1512_p6 = por %p1511_p13, %p1510_p4 }
  0x5a   : > { %p1513_p10 = pnand %p1512_p6, %p1506_p5 }
  0x5c   : > { %1516 = shalt.err (!%p1513_p10)
}
  0x5d   : > { %1351 = dma.hbm_to_vmem [thread:$0]  (!%p1780_p11), %s1776_s14, 128, %s1778_s16, %s234_s17  }
  0x5e   : > { %253 = sbr.rel (%p1683_p8) target bundleno = 2474 (0x9aa), region = 44  ;;  %s1812_s18 = sand.u32 (!%p1683_p8), 1, %s1579_s22  }
  0x5f   : > { %s1183_s30 = sshll.u32 (!%p1683_p8), %s1812_s18, 3  ;;  %s256_s13 = scalar_lea.sflag (!%p1683_p8), [#allocation3], %s1812_s18 }
  0x60   : > { %s259_s10 = scalar_lea.vmem (!%p1683_p8), [#allocation2], %s1183_s30  ;;  %p2006_p4 = scmp.ne.s32.totalorder (!%p1683_p8), %s1999_s27, 0 }
  0x65   : > { %1562 = dma.done.wait (%p2006_p4), %s256_s13, 128  }
  0x66   : > { %1564 = vsyncadd (%p2006_p4), %s256_s13, 4294967168  ;;  %p2007_p5 = scmp.eq.s32.totalorder %s1664_s25, 0 }
  0x68   : > { %1566 = dma.done.wait (%p2007_p5), [#allocation6], 512   ;;  %p2008_p8 = pmov %p2007_p5 }
  0x69   : > { %v1594_v0 = vmov 0.0   ;;  %vm1595_vm0 = vmmov 0   ;;  %v1411_v1 = vld [vmem:[#allocation5] sm:$0xff]   ;;  %v1412_v2 = vld [vmem:[#allocation5 + $0x8] sm:$0xff]   ;;  %v1832_v3 = vld [vmem:[%s259_s10] sm:$0xff]  ;;  %vm322_vm1 = vcmask 261120  }
  0x6a   : > { %1568 = vsyncadd (%p2008_p8), [#allocation6], 4294966784  ;;  %1241 = vmatprep.subr.bf16.mxu0 %v1594_v0  ;;  %1245 = vmatprep.mubr.msk.bf16.mxu0 %vm1595_vm0, %v1594_v0  ;;  %v298_v4 = vpack.c.bf16 %v1832_v3, %v1832_v3  ;;  %v1187_v5 = vld [vmem:[%s1991_s2] ss:$0 sm:$0xff]  ;;  %s1596_s14 = smov 120   ;;  %s1597_s16 = smov 96  }
  0x6b   : > { %1249 = vmatprep.subr.bf16.mxu1 %v1594_v0  ;;  %1251 = vmatprep.mubr.msk.bf16.mxu1 %vm1595_vm0, %v1594_v0  ;;  %s1598_s7 = smov 88   ;;  %vm374_vm2 = vcmask 64512   ;;  %s1599_s17 = smov 56   ;;  %vm436_vm3 = vcmask 1043456   ;;  %v367_v43 = vld [vmem:[#allocation7] sm:$0xf] }
  0x6c   : > { %1242 = vmatpush3.bf16.msra.mxu0 %v1411_v1  ;;  %s1600_s19 = smov 64   ;;  %s1601_s12 = smov 80   ;;  %v644_v44 = vsel %vm436_vm3, %v367_v43, 0  ;;  %v368_v45 = vld [vmem:[#allocation7 + $0x4] sm:$0xf] }
  0x6d   : > { %1243 = vmatprep.subr.bf16.mxu0 %v1594_v0  ;;  %s1602_s20 = smov 112   ;;  %s1603_s15 = smov 72   ;;  %v598_v46 = vsel %vm436_vm3, %v368_v45, 0 }
  0x6e   : > { %s1604_s8 = smov 48   ;;  %s1605_s13 = smov 104  }
  0x6f   : > { %s1606_s10 = smov 40   ;;  %p2009_p0 = scmp.ne.s32.totalorder %s2004_s9, 0 }
  0x70   : > { %1244 = vmatpush3.bf16.msra.mxu0 %v1412_v2 }
  0x71   : > { %1255 = vmatprep.subr.bf16.mxu0 %v1594_v0 }
  0x73   : > { %1246 = vmatmul.mubr.msk.bf16.vlgmr.msra.gmra.mrb[0].mxu0 %vm322_vm1, %v298_v4 }
  0x74   : > { %1257 = vmatprep.mubr.msk.bf16.mxu0 %vm1595_vm0, %v1594_v0 }
 0x146   : > { %v360_v6 = vpop.f32.mrb[0].mxu0 }
 0x147   : > { %v361_v7 = vadd.f32 %v1187_v5, %v360_v6  ;;  %v1247_v8 = vpop.f32.mrb[1].mxu0 }
 0x148   : > { %v363_v9 = vpop.f32.mrb[2].mxu0 }
 0x149   : > { %v1844_v10 = vpack.c.bf16 %v361_v7, %v361_v7  ;;  %v1248_v11 = vpop.f32.mrb[3].mxu0 }
 0x14b   : > { %483 = vrot.lane.b32.xlu1 %v1844_v10, %s1596_s14  ;;  %372 = vrot.lane.b32.xlu0 %v1844_v10, %s1597_s16 }
 0x14f   : > { %485 = vrot.lane.b32.xlu0 %v1844_v10, %s1598_s7 }
 0x1bd   : > { %v373_v12 = vpop.permute.xlu0 %372  ;;  %v484_v16 = vpop.permute.xlu1 %483 }
 0x1be   : > { %v379_v13 = vsel %vm374_vm2, %v373_v12, 0 }
 0x1bf   : > { %1250 = vmatpush3.bf16.xpose.msra.mxu1 %v379_v13 }
 0x1c0   : > { %1261 = vmatprep.subr.bf16.mxu1 %v1594_v0 }
 0x1c1   : > { %v486_v14 = vpop.permute.xlu0 %485 }
 0x1c2   : > { %v491_v15 = vsel %vm374_vm2, %v486_v14, 0 }
 0x1c6   : > { %1252 = vmatmul.mubr.msk.bf16.vlgmr.msra.gmra.mrb[0].mxu1 %vm374_vm2, %v1844_v10 }
 0x1c7   : > { %1262 = vmatpush3.bf16.xpose.msra.mxu1 %v491_v15  ;;  %1263 = vmatprep.mubr.msk.bf16.mxu1 %vm1595_vm0, %v1594_v0 }
 0x1c8   : > { %1273 = vmatprep.subr.bf16.mxu1 %v1594_v0 }
 0x1ce   : > { %1264 = vmatmul.mubr.msk.bf16.vlgmr.msra.gmra.mrb[4].mxu1 %vm374_vm2, %v484_v16 }
 0x1cf   : > { %1275 = vmatprep.mubr.msk.bf16.mxu1 %vm1595_vm0, %v1594_v0  ;;  %1274 = vmatpush3.bf16.msra.mxu1 %v598_v46 }
 0x1d0   : > { %1285 = vmatprep.subr.bf16.mxu1 %v1594_v0 }
 0x299   : > { %v415_v17 = vpop.f32.mrb[0].mxu1 }
 0x29a   : > { %v1253_v18 = vpop.f32.mrb[1].mxu1  ;;  %v421_v19 = vsel %vm374_vm2, %v415_v17, -inf }
 0x29b   : > { %422 = vmax.xlane.f32.xlu1 %v421_v19  ;;  %v418_v20 = vpop.f32.mrb[2].mxu1 }
 0x29c   : > { %v1254_v21 = vpop.f32.mrb[3].mxu1 }
 0x2a1   : > { %v527_v22 = vpop.f32.mrb[4].mxu1 }
 0x2a2   : > { %v1265_v23 = vpop.f32.mrb[5].mxu1  ;;  %v533_v24 = vsel %vm374_vm2, %v527_v22, -inf }
 0x2a3   : > { %534 = vmax.xlane.f32.xlu0 %v533_v24  ;;  %v530_v25 = vpop.f32.mrb[6].mxu1 }
 0x2a4   : > { %v1266_v26 = vpop.f32.mrb[7].mxu1 }
 0x2ac   : > { %543 = vrot.lane.b32.xlu1 %v1844_v10, %s1599_s17 }
 0x2b9   : > { %431 = vrot.lane.b32.xlu0 %v1844_v10, %s1600_s19  ;;  %s1208_s19 = sshll.u32 %s1664_s25, 7  ;;  %s1073_s25 = scalar_lea.sflag [#allocation4], %s1812_s18 }
 0x2bd   : > { %688 = vrot.lane.b32.xlu0 %v1844_v10, %s1601_s12  ;;  %s295_s12 = scalar_lea.vmem [#allocation8], %s1183_s30 }
 0x2c1   : > { %686 = vrot.lane.b32.xlu0 %v1844_v10, %s1602_s20  ;;  %s1086_s20 = sshll.u32 %s295_s12, 4  ;;  %s1946_s20 = int_to_ptr.vmem [resolvable:$true] %s1086_s20 }
 0x2c2   : > { %s1517_s30 = scalar_lea.vmem %s1946_s20, 128 }
 0x2c3   : > { %p1518_p11 = scmp.ne.s32.totalorder %s1946_s20, %s1517_s30 }
 0x2c5   : > { %p1519_p1 = pnand %p1518_p11, %p2009_p0 }
 0x2c7   : > { %p1520_p3 = pneg %p1519_p1 }
 0x328   : > { %v423_v27 = vpop.xlane.xlu1 %422 }
 0x329   : > { %v424_v28 = vsub.f32 %v415_v17, %v423_v27 }
 0x32b   : > { %v425_v29 = vmul.f32 1.442695, %v424_v28 }
 0x32c   : > { %v544_v36 = vpop.permute.xlu1 %543 }
 0x32d   : > { %1415 = vpow2.f32 %v425_v29  ;;  %v549_v39 = vsel %vm436_vm3, %v544_v36, 0 }
 0x330   : > { %v535_v30 = vpop.xlane.xlu0 %534 }
 0x331   : > { %v536_v31 = vsub.f32 %v527_v22, %v535_v30  ;;  %v369_v30 = vld [vmem:[#allocation7 + $0x8] sm:$0xf] }
 0x333   : > { %v537_v32 = vmul.f32 1.442695, %v536_v31  ;;  %v801_v31 = vsel %vm436_vm3, %v369_v30, 0 }
 0x334   : > { %v432_v33 = vpop.permute.xlu0 %431 }
 0x335   : > { %1417 = vpow2.f32 %v537_v32  ;;  %v438_v34 = vsel %vm436_vm3, %v432_v33, 0 }
 0x336   : > { %1256 = vmatpush3.bf16.msra.mxu0 %v438_v34 }
 0x337   : > { %v1416_v35 = vpop.eup %1415  ;;  %1267 = vmatprep.subr.bf16.mxu0 %v1594_v0 }
 0x338   : > { %v427_v37 = vsel %vm374_vm2, %v1416_v35, 0.0  ;;  %v430_v38 = vpack.c.bf16 %v1416_v35, %v1416_v35  ;;  %v689_v47 = vpop.permute.xlu0 %688 }
 0x339   : > { %428 = vadd.xlane.f32.xlu0 %v427_v37  ;;  %v694_v2 = vsel %vm374_vm2, %v689_v47, 0 }
 0x33a   : > { %1258 = vmatmul.mubr.msk.bf16.vlgmr.msra.gmra.mrb[4].mxu0 %vm374_vm2, %v430_v38 }
 0x33b   : > { %1268 = vmatpush3.bf16.msra.mxu0 %v549_v39  ;;  %1269 = vmatprep.mubr.msk.bf16.mxu0 %vm1595_vm0, %v1594_v0 }
 0x33c   : > { %1279 = vmatprep.subr.bf16.mxu0 %v1594_v0  ;;  %v687_v48 = vpop.permute.xlu0 %686 }
 0x33f   : > { %v1418_v40 = vpop.eup %1417 }
 0x340   : > { %v539_v41 = vsel %vm374_vm2, %v1418_v40, 0.0  ;;  %v542_v42 = vpack.c.bf16 %v1418_v40, %v1418_v40 }
 0x341   : > { %540 = vadd.xlane.f32.xlu1 %v539_v41 }
 0x342   : > { %1270 = vmatmul.mubr.msk.bf16.vlgmr.msra.gmra.mrb[8].mxu0 %vm374_vm2, %v542_v42 }
 0x343   : > { %1281 = vmatprep.mubr.msk.bf16.mxu0 %vm1595_vm0, %v1594_v0  ;;  %1280 = vmatpush3.bf16.msra.mxu0 %v644_v44 }
 0x344   : > { %1291 = vmatprep.subr.bf16.mxu0 %v1594_v0 }
 0x34f   : > { %846 = vrot.lane.b32.xlu0 %v1844_v10, %s1603_s15 }
 0x3c6   : > { %v429_v49 = vpop.xlane.xlu0 %428 }
 0x3c7   : > { %1419 = vrcp.f32 %v429_v49 }
 0x3ca   : > { %v847_v25 = vpop.permute.xlu0 %846 }
 0x3cb   : > { %v852_v28 = vsel %vm374_vm2, %v847_v25, 0 }
 0x3ce   : > { %v541_v50 = vpop.xlane.xlu1 %540 }
 0x3cf   : > { %1421 = vrcp.f32 %v541_v50 }
 0x3d1   : > { %v1420_v51 = vpop.eup %1419 }
 0x3d9   : > { %v1422_v58 = vpop.eup %1421 }
 0x40d   : > { %v474_v52 = vpop.f32.mrb[4].mxu0 }
 0x40e   : > { %v481_v53 = vmul.f32 %v1420_v51, %v474_v52  ;;  %v1259_v54 = vpop.f32.mrb[5].mxu0 }
 0x40f   : > { %v477_v55 = vpop.f32.mrb[6].mxu0 }
 0x410   : > { %v482_v56 = vpack.c.bf16 %v481_v53, %v481_v53  ;;  %v1260_v57 = vpop.f32.mrb[7].mxu0 }
 0x411   : > { %v370_v57 = vld [vmem:[#allocation7 + $0xc] sm:$0xf] }
 0x412   : > { %1282 = vmatmul.mubr.msk.bf16.vlgmr.msra.gmra.mrb[12].mxu0 %vm374_vm2, %v482_v56 }
 0x413   : > { %1293 = vmatprep.mubr.msk.bf16.mxu0 %vm1595_vm0, %v1594_v0 }
 0x415   : > { %v585_v59 = vpop.f32.mrb[8].mxu0 }
 0x416   : > { %v592_v60 = vmul.f32 %v1422_v58, %v585_v59  ;;  %v1271_v61 = vpop.f32.mrb[9].mxu0  ;;  %v959_v58 = vsel %vm436_vm3, %v370_v57, 0 }
 0x417   : > { %v588_v62 = vpop.f32.mrb[10].mxu0 }
 0x418   : > { %v593_v63 = vpack.c.bf16 %v592_v60, %v592_v60  ;;  %v1272_v1 = vpop.f32.mrb[11].mxu0 }
 0x41a   : > { %1276 = vmatmul.mubr.msk.bf16.vlgmr.msra.gmra.mrb[8].mxu1 %vm374_vm2, %v593_v63 }
 0x41b   : > { %1286 = vmatpush3.bf16.xpose.msra.mxu1 %v694_v2  ;;  %1287 = vmatprep.mubr.msk.bf16.mxu1 %vm1595_vm0, %v1594_v0 }
 0x41c   : > { %1297 = vmatprep.subr.bf16.mxu1 %v1594_v0 }
 0x422   : > { %1288 = vmatmul.mubr.msk.bf16.vlgmr.msra.gmra.mrb[12].mxu1 %vm374_vm2, %v687_v48 }
 0x423   : > { %1299 = vmatprep.mubr.msk.bf16.mxu1 %vm1595_vm0, %v1594_v0  ;;  %1298 = vmatpush3.bf16.msra.mxu1 %v801_v31 }
 0x424   : > { %1309 = vmatprep.subr.bf16.mxu1 %v1594_v0 }
 0x4e5   : > { %v680_v4 = vpop.f32.mrb[12].mxu0 }
 0x4e6   : > { %v1283_v5 = vpop.f32.mrb[13].mxu0 }
 0x4e7   : > { %v683_v6 = vpop.f32.mrb[14].mxu0  ;;  %v1413_v5 = vld [vmem:[%s1994_s5] sm:$0xff]  }
 0x4e8   : > { %v1284_v7 = vpop.f32.mrb[15].mxu0  ;;  %v1414_v6 = vld [vmem:[%s1994_s5 + $0x8] sm:$0xff]  }
 0x4ed   : > { %v634_v8 = vpop.f32.mrb[8].mxu1 }
 0x4ee   : > { %v1894_v9 = vadd.f32 %v680_v4, %v634_v8  ;;  %v1277_v11 = vpop.f32.mrb[9].mxu1  ;;  %v1203_v8 = vld [vmem:[%s1993_s4] ss:$0 sm:$0xff] }
 0x4ef   : > { %v637_v12 = vpop.f32.mrb[10].mxu1 }
 0x4f0   : > { %v1278_v13 = vpop.f32.mrb[11].mxu1 }
 0x4f5   : > { %v730_v14 = vpop.f32.mrb[12].mxu1 }
 0x4f6   : > { %v1289_v15 = vpop.f32.mrb[13].mxu1  ;;  %v736_v16 = vsel %vm374_vm2, %v730_v14, -inf }
 0x4f7   : > { %737 = vmax.xlane.f32.xlu1 %v736_v16  ;;  %v733_v17 = vpop.f32.mrb[14].mxu1 }
 0x4f8   : > { %v1290_v18 = vpop.f32.mrb[15].mxu1 }
 0x508   : > { %746 = vrot.lane.b32.xlu1 %v1844_v10, %s1604_s8 }
 0x50c   : > { %844 = vrot.lane.b32.xlu1 %v1844_v10, %s1605_s13  ;;  %s1944_s13 = scalar_lea.hbm %s1995_s6, %s1208_s19 }
 0x584   : > { %v738_v19 = vpop.xlane.xlu1 %737 }
 0x585   : > { %v739_v20 = vsub.f32 %v730_v14, %v738_v19 }
 0x587   : > { %v740_v21 = vmul.f32 1.442695, %v739_v20 }
 0x588   : > { %v747_v22 = vpop.permute.xlu1 %746 }
 0x589   : > { %1423 = vpow2.f32 %v740_v21  ;;  %v752_v23 = vsel %vm436_vm3, %v747_v22, 0 }
 0x58a   : > { %1292 = vmatpush3.bf16.msra.mxu0 %v752_v23 }
 0x58b   : > { %1303 = vmatprep.subr.bf16.mxu0 %v1594_v0 }
 0x58c   : > { %v845_v29 = vpop.permute.xlu1 %844 }
 0x593   : > { %v1424_v24 = vpop.eup %1423 }
 0x594   : > { %v742_v26 = vsel %vm374_vm2, %v1424_v24, 0.0  ;;  %v745_v27 = vpack.c.bf16 %v1424_v24, %v1424_v24 }
 0x595   : > { %743 = vadd.xlane.f32.xlu1 %v742_v26 }
 0x596   : > { %1294 = vmatmul.mubr.msk.bf16.vlgmr.msra.gmra.mrb[16].mxu0 %vm374_vm2, %v745_v27 }
 0x597   : > { %1304 = vmatpush3.bf16.xpose.msra.mxu0 %v852_v28  ;;  %1305 = vmatprep.mubr.msk.bf16.mxu0 %vm1595_vm0, %v1594_v0 }
 0x598   : > { %1315 = vmatprep.subr.bf16.mxu0 %v1594_v0 }
 0x59e   : > { %1306 = vmatmul.mubr.msk.bf16.vlgmr.msra.gmra.mrb[20].mxu0 %vm374_vm2, %v845_v29 }
 0x59f   : > { %1317 = vmatprep.mubr.msk.bf16.mxu0 %vm1595_vm0, %v1594_v0  ;;  %1316 = vmatpush3.bf16.msra.mxu0 %v959_v58 }
 0x622   : > { %v744_v32 = vpop.xlane.xlu1 %743 }
 0x623   : > { %1425 = vrcp.f32 %v744_v32 }
 0x62d   : > { %v1426_v33 = vpop.eup %1425 }
 0x669   : > { %v788_v34 = vpop.f32.mrb[16].mxu0 }
 0x66a   : > { %v795_v35 = vmul.f32 %v1426_v33, %v788_v34  ;;  %v1295_v36 = vpop.f32.mrb[17].mxu0 }
 0x66b   : > { %v791_v37 = vpop.f32.mrb[18].mxu0 }
 0x66c   : > { %v796_v38 = vpack.c.bf16 %v795_v35, %v795_v35  ;;  %v1296_v39 = vpop.f32.mrb[19].mxu0 }
 0x66e   : > { %1300 = vmatmul.mubr.msk.bf16.vlgmr.msra.gmra.mrb[16].mxu1 %vm374_vm2, %v796_v38 }
 0x66f   : > { %1311 = vmatprep.mubr.msk.bf16.mxu1 %vm1595_vm0, %v1594_v0 }
 0x671   : > { %v888_v40 = vpop.f32.mrb[20].mxu0 }
 0x672   : > { %v1307_v41 = vpop.f32.mrb[21].mxu0  ;;  %v894_v42 = vsel %vm374_vm2, %v888_v40, -inf }
 0x673   : > { %895 = vmax.xlane.f32.xlu0 %v894_v42  ;;  %v891_v43 = vpop.f32.mrb[22].mxu0 }
 0x674   : > { %v1308_v44 = vpop.f32.mrb[23].mxu0 }
 0x689   : > { %904 = vrot.lane.b32.xlu0 %v1844_v10, %s1606_s10  ;;  %s1607_s10 = smov [#allocation8]  }
 0x68a   : > { %s1521_s27 = sshll.u32 %s1607_s10, 4  ;;  %s1522_s27 = int_to_ptr.vmem [resolvable:$false] %s1521_s27 }
 0x68b   : > { %s1523_s29 = scalar_lea.vmem %s1522_s27, 256  ;;  %p1524_p7 = scmp.lt.s32.totalorder %s1946_s20, %s1522_s27 }
 0x68c   : > { %p1525_p9 = scmp.lt.s32.totalorder %s1523_s29, %s1517_s30 }
 0x68e   : > { %p1526_p12 = por %p1525_p9, %p1524_p7 }
 0x690   : > { %p1527_p2 = pnand %p1526_p12, %p1520_p3 }
 0x700   : > { %v896_v45 = vpop.xlane.xlu0 %895 }
 0x701   : > { %v897_v46 = vsub.f32 %v888_v40, %v896_v45 }
 0x703   : > { %v898_v47 = vmul.f32 1.442695, %v897_v46 }
 0x704   : > { %v905_v48 = vpop.permute.xlu0 %904 }
 0x705   : > { %1427 = vpow2.f32 %v898_v47  ;;  %v910_v49 = vsel %vm436_vm3, %v905_v48, 0 }
 0x706   : > { %1310 = vmatpush3.bf16.msra.mxu1 %v910_v49 }
 0x707   : > { %1321 = vmatprep.subr.bf16.mxu1 %v1594_v0 }
 0x70f   : > { %v1428_v50 = vpop.eup %1427 }
 0x710   : > { %v900_v51 = vsel %vm374_vm2, %v1428_v50, 0.0  ;;  %v903_v52 = vpack.c.bf16 %v1428_v50, %v1428_v50 }
 0x711   : > { %901 = vadd.xlane.f32.xlu1 %v900_v51 }
 0x712   : > { %1312 = vmatmul.mubr.msk.bf16.vlgmr.msra.gmra.mrb[20].mxu1 %vm374_vm2, %v903_v52 }
 0x713   : > { %1325 = vmatprep.mubr.msk.bf16.mxu1 %vm1595_vm0, %v1594_v0  ;;  %1322 = vmatpush3.bf16.msra.mxu1 %v1413_v5 }
 0x714   : > { %1323 = vmatprep.subr.bf16.mxu1 %v1594_v0 }
 0x717   : > { %1324 = vmatpush3.bf16.msra.mxu1 %v1414_v6 }
 0x741   : > { %v837_v10 = vpop.f32.mrb[16].mxu1 }
 0x742   : > { %v843_v53 = vadd.f32 %v837_v10, %v1894_v9  ;;  %v1301_v54 = vpop.f32.mrb[17].mxu1 }
 0x743   : > { %v840_v55 = vpop.f32.mrb[18].mxu1 }
 0x744   : > { %v1302_v56 = vpop.f32.mrb[19].mxu1 }
 0x79e   : > { %v902_v59 = vpop.xlane.xlu1 %901 }
 0x79f   : > { %1429 = vrcp.f32 %v902_v59 }
 0x7a9   : > { %v1430_v60 = vpop.eup %1429 }
 0x7e5   : > { %v946_v61 = vpop.f32.mrb[20].mxu1 }
 0x7e6   : > { %v953_v62 = vmul.f32 %v1430_v60, %v946_v61  ;;  %v1313_v63 = vpop.f32.mrb[21].mxu1 }
 0x7e7   : > { %v949_v1 = vpop.f32.mrb[22].mxu1 }
 0x7e8   : > { %v954_v2 = vpack.c.bf16 %v953_v62, %v953_v62  ;;  %v1314_v4 = vpop.f32.mrb[23].mxu1 }
 0x7ea   : > { %1318 = vmatmul.mubr.msk.bf16.vlgmr.msra.gmra.mrb[24].mxu0 %vm374_vm2, %v954_v2 }
 0x8bd   : > { %v995_v7 = vpop.f32.mrb[24].mxu0 }
 0x8be   : > { %v1001_v9 = vadd.f32 %v995_v7, %v843_v53  ;;  %v1319_v11 = vpop.f32.mrb[25].mxu0 }
 0x8bf   : > { %v998_v12 = vpop.f32.mrb[26].mxu0 }
 0x8c0   : > { %v1009_v13 = vadd.f32 %v1203_v8, %v1001_v9  ;;  %v1320_v14 = vpop.f32.mrb[27].mxu0 }
 0x8c2   : > { %v1010_v15 = vadd.f32 %v1009_v13, %v1832_v3 }
 0x8c4   : > { %v1011_v16 = vpack.c.bf16 %v1010_v15, %v1010_v15 }
 0x8c6   : > { %1326 = vmatmul.mubr.msk.bf16.vlgmr.msra.gmra.mrb[24].mxu1 %vm322_vm1, %v1011_v16 }
 0x999   : > { %v1065_v0 = vpop.f32.mrb[24].mxu1 }
 0x99a   : > { %v1066_v17 = vadd.f32 %v1065_v0, %v1010_v15  ;;  %v1327_v18 = vpop.f32.mrb[25].mxu1 }
 0x99b   : > { %v1068_v3 = vpop.f32.mrb[26].mxu1 }
 0x99c   : > { %v1328_v19 = vpop.f32.mrb[27].mxu1  ;;  %1071 = vst.msk [vmem:[%s295_s12] sm:$0xff] %vm322_vm1, %v1066_v17 }
 0x99d   : > { %1530 = shalt.err (!%p1527_p2)
}
 0x99e   : > { %s1531_s18 = scalar_lea.hbm %s1944_s13, 128  ;;  %s1535_s7 = scalar_lea.hbm %s1995_s6, 256 }
 0x99f   : > { %p1532_p13 = scmp.ne.s32.totalorder %s1944_s13, %s1531_s18  ;;  %p1536_p4 = scmp.lt.u32.totalorder %s1944_s13, %s1995_s6 }
 0x9a0   : > { %p1537_p5 = scmp.lt.u32.totalorder %s1535_s7, %s1531_s18  ;;  %p1539_p11 = scmp.lt.u32.totalorder %s1531_s18, %s1944_s13 }
 0x9a1   : > { %p1533_p6 = pnand %p1532_p13, %p2009_p0 }
 0x9a2   : > { %p1538_p8 = por %p1537_p5, %p1536_p4 }
 0x9a3   : > { %p1534_p10 = pneg %p1533_p6 }
 0x9a4   : > { %p1540_p1 = por %p1539_p11, %p1538_p8 }
 0x9a6   : > { %p1541_p3 = pnand %p1540_p1, %p1534_p10 }
 0x9a8   : > { %1544 = shalt.err (!%p1541_p3)
}
 0x9a9   : > { %1339 = dma.vmem_to_hbm [thread:$0]  (%p2009_p0), %s1946_s20, 128, %s1944_s13, %s1073_s25  }
 0x9aa PF: > { %s1098_s12 = sand.u32 1, %s1575_s21   ;;  %p2010_p7 = scmp.ne.s32.totalorder %s2000_s28, 0 }
 0x9ab   : > { %p2011_p9 = scmp.ge.s32.totalorder %s1587_s24, 2  ;;  %s1099_s15 = scalar_lea.sflag [#allocation4], %s1098_s12 }
 0x9ad   : > { %p1353_p12 = pnand %p2011_p9, %p2010_p7 }
 0x9af   : > { %1570 = dma.done.wait (!%p1353_p12), %s1099_s15, 128  }
 0x9b0   : > { %1572 = vsyncadd (!%p1353_p12), %s1099_s15, 4294967168  ;;  %p20_p2 = scmp.ge.s32.totalorder %s1753_s26, 4   ;;  %s2012_s21 = smov %s1579_s22 }
 0x9b1   : > { %s2013_s22 = smov %s1583_s23  ;;  %s2014_s23 = smov %s1769_s11 }
 0x9b2   : > { %s2015_s24 = smov %s1753_s26  ;;  %22 = sbr.rel (!%p20_p2) target bundleno = 6 (0x6), region = 97 }
 0x9b9   :  { %1104 = vsyncpa [#allocation3], 1 }
 0x9ba   :  { %1106 = vsyncpa [#allocation3 + $0x1], 1 }
 0x9bb   :  { %1107 = vsyncpa [#allocation6], 1 }
 0x9bc   :  { %1108 = vsyncpa [#allocation4], 1 }
 0x9bd   :  { %1110 = vsyncpa [#allocation4 + $0x1], 1 }

// kernel: tpu_custom_call.1
= control target key start
LH: loop header
LB: loop body
LE: loop exit
PB: predicated region body
PF: predicated region fallthrough
CT: control target
= control target key end

     0   :  { %11 = vsyncpa [#allocation3], 0  ;;  %s1989_s0 = inlined_call_operand.hbm [shape: f32[16,32], index: 0, kind: input, shape index: {}]   ;;  %s1990_s1 = inlined_call_operand.hbm [shape: bf16[32,96], index: 1, kind: input, shape index: {}]   ;;  %s1991_s2 = inlined_call_operand.vmem [shape: f32[1,96], index: 2, kind: input, shape index: {}]   ;;  %s1992_s3 = inlined_call_operand.hbm [shape: bf16[32,32], index: 3, kind: input, shape index: {}]   ;;  %s1993_s4 = inlined_call_operand.vmem [shape: f32[1,32], index: 4, kind: input, shape index: {}]   ;;  %s1994_s5 = inlined_call_operand.vmem [shape: bf16[32,32], index: 5, kind: input, shape index: {}]   ;;  %s1995_s6 = inlined_call_operand.hbm [shape: f32[16,32], index: 6, kind: output, shape index: {}]  }
   0x1   :  { %13 = vsyncpa [#allocation3 + $0x1], 0 }
   0x2   :  { %14 = vsyncpa [#allocation6], 0 }
   0x3   :  { %15 = vsyncpa [#allocation4], 0 }
   0x4   :  { %17 = vsyncpa [#allocation4 + $0x1], 0  ;;  %s1643_s21 = smov 0   ;;  %s1645_s22 = smov 0  }
   0x5   :  { %s1647_s23 = smov 0   ;;  %s1649_s24 = smov 0  }
   0x6 LB: > { %s1664_s25 = sadd.s32 4294967295, %s1587_s24   ;;  %s1175_s26 = sadd.s32 4294967294, %s1587_s24   ;;  %s1587_s24 = sphi %s1649_s24, %s2015_s24   ;;  %s1583_s23 = sphi %s1647_s23, %s2014_s23   ;;  %s1579_s22 = sphi %s1645_s22, %s2013_s22   ;;  %s1575_s21 = sphi %s1643_s21, %s2012_s21  }
   0x7   : > { %p43_p0 = scmp.ne.s32.totalorder %s1579_s22, %s1575_s21  ;;  %p1996_p1 = scmp.eq.s32.totalorder %s1664_s25, 0 }
   0x8   : > { %p178_p3 = scmp.eq.s32.totalorder %s1175_s26, 1  ;;  %p1176_p5 = scmp.ge.s32.totalorder %s1587_s24, 1 }
   0x9   : > { %p1673_p4 = por %p1996_p1, %p43_p0  ;;  %p185_p7 = scmp.lt.s32.totalorder %s1587_s24, 3 }
   0xa   : > { %p1678_p6 = por %p178_p3, %p43_p0  ;;  %s1589_s30 = smov [#allocation5]  }
   0xb   : > { %s1999_s27 = scalar_select %p1673_p4, 1, 0 }
   0xc   : > { %s2000_s28 = scalar_select %p1678_p6, 1, 0 }
   0xd   : > { %p1683_p8 = pnand %p1176_p5, %p185_p7  ;;  %s197_s7 = sshll.u32 %s1589_s30, 4  ;;  %s1687_s7 = int_to_ptr.vmem [resolvable:$true] %s197_s7 }
   0xe   : > { %s1590_s9 = smov [#allocation7]   ;;  %s1431_s13 = scalar_lea.hbm %s1990_s1, 256 }
   0xf   : > { %p1341_p9 = pneg %p1683_p8  ;;  %s213_s10 = sshll.u32 %s1590_s9, 4  ;;  %s1698_s10 = int_to_ptr.vmem [resolvable:$true] %s213_s10 }
  0x10   : > { %p1432_p12 = scmp.ne.s32.totalorder %s1990_s1, %s1431_s13  ;;  %p1438_p5 = scmp.lt.u32.totalorder %s1431_s13, %s1990_s1 }
  0x11   : > { %p1694_p11 = pnand %p1341_p9, %p1996_p1 }
  0x13   : > { %p1433_p13 = pneg %p1694_p11 }
  0x15   : > { %p1434_p0 = pnand %p1433_p13, %p1432_p12 }
  0x17   : > { %p1435_p3 = pneg %p1434_p0 }
  0x19   : > { %p1440_p7 = pnand %p1438_p5, %p1435_p3 }
  0x1b   : > { %1443 = shalt.err (!%p1440_p7)
}
  0x1c   : > { %s1444_s18 = scalar_lea.vmem %s1687_s7, 256  ;;  %p1452_p2 = scmp.lt.s32.totalorder %s1687_s7, %s1687_s7 }
  0x1d   : > { %p1445_p9 = scmp.ne.s32.totalorder %s1687_s7, %s1444_s18  ;;  %p1453_p12 = scmp.lt.s32.totalorder %s1444_s18, %s1444_s18 }
  0x1f   : > { %p1447_p10 = pnand %p1445_p9, %p1433_p13  ;;  %p1454_p0 = por %p1453_p12, %p1452_p2 }
  0x21   : > { %p1448_p1 = pneg %p1447_p10 }
  0x23   : > { %p1455_p6 = pnand %p1454_p0, %p1448_p1 }
  0x25   : > { %1458 = shalt.err (!%p1455_p6)
}
  0x26   : > { %s1591_s19 = smov 64   ;;  %s1592_s20 = smov 4  }
  0x27   : > { %1344 = dma.hbm_to_vmem [thread:$0]  (!%p1694_p11), %s1990_s1, 256, %s1687_s7, [#allocation6], %s1591_s19, %s1591_s19, %s1592_s20  }
  0x28   : > { %s1459_s12 = scalar_lea.hbm %s1992_s3, 256 }
  0x29   : > { %p1460_p2 = scmp.ne.s32.totalorder %s1992_s3, %s1459_s12  ;;  %p1466_p10 = scmp.lt.u32.totalorder %s1459_s12, %s1992_s3 }
  0x2b   : > { %p1462_p1 = pnand %p1460_p2, %p1433_p13 }
  0x2d   : > { %p1463_p6 = pneg %p1462_p1 }
  0x2f   : > { %p1468_p3 = pnand %p1466_p10, %p1463_p6 }
  0x31   : > { %1471 = shalt.err (!%p1468_p3)
}
  0x32   : > { %s1472_s7 = scalar_lea.vmem %s1698_s10, 256  ;;  %p1480_p12 = scmp.lt.s32.totalorder %s1698_s10, %s1698_s10 }
  0x33   : > { %p1473_p5 = scmp.ne.s32.totalorder %s1698_s10, %s1472_s7  ;;  %p1481_p0 = scmp.lt.s32.totalorder %s1472_s7, %s1472_s7 }
  0x35   : > { %p1475_p7 = pnand %p1473_p5, %p1433_p13  ;;  %p1482_p2 = por %p1481_p0, %p1480_p12 }
  0x37   : > { %p1476_p9 = pneg %p1475_p7 }
  0x39   : > { %p1483_p1 = pnand %p1482_p2, %p1476_p9 }
  0x3b   : > { %1486 = shalt.err (!%p1483_p1)
}
  0x3c   : > { %1347 = dma.hbm_to_vmem [thread:$0]  (!%p1694_p11), %s1992_s3, 256, %s1698_s10, [#allocation6], %s1591_s19, %s1591_s19, %s1592_s20  }
  0x3d   : > { %s1753_s26 = sadd.s32 1, %s1587_s24   ;;  %s30_s8 = sadd.s32 1, %s1583_s23 }
  0x3e   : > { %s27_s30 = ssub.s32 %s1587_s24, %s1753_s26  ;;  %p37_p13 = scmp.ne.s32.totalorder %s1583_s23, %s1579_s22 }
  0x3f   : > { %p28_p6 = scmp.eq.s32.totalorder %s27_s30, 0  ;;  %p38_p10 = scmp.eq.s32.totalorder %s1587_s24, 0 }
  0x40   : > { %p2003_p3 = scmp.eq.s32.totalorder %s1664_s25, 1  ;;  %p1358_p7 = scmp.lt.s32.totalorder %s1587_s24, 2 }
  0x41   : > { %s1769_s11 = scalar_select %p28_p6, %s1583_s23, %s30_s8  }
  0x42   : > { %p1763_p5 = por %p2003_p3, %p37_p13  ;;  %p39_p9 = por %p38_p10, %p37_p13 }
  0x43   : > { %s233_s12 = sand.u32 1, %s1583_s23   ;;  %s1181_s10 = sshll.u32 %s1587_s24, 7 }
  0x44   : > { %s2004_s9 = scalar_select %p1763_p5, 1, 0 }
  0x45   : > { %s1180_s13 = sshll.u32 %s233_s12, 3  ;;  %s1776_s14 = scalar_lea.hbm %s1989_s0, %s1181_s10 }
  0x46   : > { %s237_s15 = scalar_lea.vmem [#allocation2], %s1180_s13  ;;  %p1780_p11 = pnand %p1358_p7, %p39_p9 }
  0x47   : > { %s244_s16 = sshll.u32 %s237_s15, 4  ;;  %s234_s17 = scalar_lea.sflag [#allocation3], %s233_s12  ;;  %s1778_s16 = int_to_ptr.vmem [resolvable:$true] %s244_s16 }
  0x48   : > { %s1487_s18 = scalar_lea.hbm %s1776_s14, 128  ;;  %p1489_p0 = pneg %p1780_p11 }
  0x49   : > { %p1488_p12 = scmp.ne.s32.totalorder %s1776_s14, %s1487_s18  ;;  %s1492_s13 = scalar_lea.hbm %s1989_s0, 256 }
  0x4a   : > { %p1493_p13 = scmp.lt.u32.totalorder %s1776_s14, %s1989_s0  ;;  %p1494_p6 = scmp.lt.u32.totalorder %s1492_s13, %s1487_s18 }
  0x4b   : > { %p1490_p2 = pnand %p1489_p0, %p1488_p12  ;;  %p1496_p3 = scmp.lt.u32.totalorder %s1487_s18, %s1776_s14 }
  0x4c   : > { %p1495_p10 = por %p1494_p6, %p1493_p13 }
  0x4d   : > { %p1491_p1 = pneg %p1490_p2 }
  0x4e   : > { %p1497_p7 = por %p1496_p3, %p1495_p10 }
  0x50   : > { %p1498_p9 = pnand %p1497_p7, %p1491_p1 }
  0x52   : > { %1501 = shalt.err (!%p1498_p9)
}
  0x53   : > { %s1502_s12 = scalar_lea.vmem %s1778_s16, 128  ;;  %s1593_s20 = smov [#allocation2]  }
  0x54   : > { %p1503_p12 = scmp.ne.s32.totalorder %s1778_s16, %s1502_s12  ;;  %s1507_s15 = sshll.u32 %s1593_s20, 4  ;;  %s1508_s15 = int_to_ptr.vmem [resolvable:$false] %s1507_s15 }
  0x55   : > { %s1509_s8 = scalar_lea.vmem %s1508_s15, 256  ;;  %p1510_p4 = scmp.lt.s32.totalorder %s1778_s16, %s1508_s15 }
  0x56   : > { %p1505_p2 = pnand %p1503_p12, %p1489_p0  ;;  %p1511_p13 = scmp.lt.s32.totalorder %s1509_s8, %s1502_s12 }
  0x58   : > { %p1506_p5 = pneg %p1505_p2  ;;  %p1512_p6 = por %p1511_p13, %p1510_p4 }
  0x5a   : > { %p1513_p10 = pnand %p1512_p6, %p1506_p5 }
  0x5c   : > { %1516 = shalt.err (!%p1513_p10)
}
  0x5d   : > { %1351 = dma.hbm_to_vmem [thread:$0]  (!%p1780_p11), %s1776_s14, 128, %s1778_s16, %s234_s17  }
  0x5e   : > { %253 = sbr.rel (%p1683_p8) target bundleno = 2474 (0x9aa), region = 44  ;;  %s1812_s18 = sand.u32 (!%p1683_p8), 1, %s1579_s22  }
  0x5f   : > { %s1183_s30 = sshll.u32 (!%p1683_p8), %s1812_s18, 3  ;;  %s256_s13 = scalar_lea.sflag (!%p1683_p8), [#allocation3], %s1812_s18 }
  0x60   : > { %s259_s10 = scalar_lea.vmem (!%p1683_p8), [#allocation2], %s1183_s30  ;;  %p2006_p4 = scmp.ne.s32.totalorder (!%p1683_p8), %s1999_s27, 0 }
  0x65   : > { %1562 = dma.done.wait (%p2006_p4), %s256_s13, 128  }
  0x66   : > { %1564 = vsyncadd (%p2006_p4), %s256_s13, 4294967168  ;;  %p2007_p5 = scmp.eq.s32.totalorder %s1664_s25, 0 }
  0x68   : > { %1566 = dma.done.wait (%p2007_p5), [#allocation6], 512   ;;  %p2008_p8 = pmov %p2007_p5 }
  0x69   : > { %v1594_v0 = vmov 0.0   ;;  %vm1595_vm0 = vmmov 0   ;;  %v1411_v1 = vld [vmem:[#allocation5] sm:$0xff]   ;;  %v1412_v2 = vld [vmem:[#allocation5 + $0x8] sm:$0xff]   ;;  %v1832_v3 = vld [vmem:[%s259_s10] sm:$0xff]  ;;  %vm322_vm1 = vcmask 261120  }
  0x6a   : > { %1568 = vsyncadd (%p2008_p8), [#allocation6], 4294966784  ;;  %1241 = vmatprep.subr.bf16.mxu0 %v1594_v0  ;;  %1245 = vmatprep.mubr.msk.bf16.mxu0 %vm1595_vm0, %v1594_v0  ;;  %v298_v4 = vpack.c.bf16 %v1832_v3, %v1832_v3  ;;  %v1187_v5 = vld [vmem:[%s1991_s2] ss:$0 sm:$0xff]  ;;  %s1596_s14 = smov 120   ;;  %s1597_s16 = smov 96  }
  0x6b   : > { %1249 = vmatprep.subr.bf16.mxu1 %v1594_v0  ;;  %1251 = vmatprep.mubr.msk.bf16.mxu1 %vm1595_vm0, %v1594_v0  ;;  %s1598_s7 = smov 88   ;;  %vm374_vm2 = vcmask 64512   ;;  %s1599_s17 = smov 56   ;;  %vm436_vm3 = vcmask 1043456   ;;  %v367_v43 = vld [vmem:[#allocation7] sm:$0xf] }
  0x6c   : > { %1242 = vmatpush3.bf16.msra.mxu0 %v1411_v1  ;;  %s1600_s19 = smov 64   ;;  %s1601_s12 = smov 80   ;;  %v644_v44 = vsel %vm436_vm3, %v367_v43, 0  ;;  %v368_v45 = vld [vmem:[#allocation7 + $0x4] sm:$0xf] }
  0x6d   : > { %1243 = vmatprep.subr.bf16.mxu0 %v1594_v0  ;;  %s1602_s20 = smov 112   ;;  %s1603_s15 = smov 72   ;;  %v598_v46 = vsel %vm436_vm3, %v368_v45, 0 }
  0x6e   : > { %s1604_s8 = smov 48   ;;  %s1605_s13 = smov 104  }
  0x6f   : > { %s1606_s10 = smov 40   ;;  %p2009_p0 = scmp.ne.s32.totalorder %s2004_s9, 0 }
  0x70   : > { %1244 = vmatpush3.bf16.msra.mxu0 %v1412_v2 }
  0x71   : > { %1255 = vmatprep.subr.bf16.mxu0 %v1594_v0 }
  0x73   : > { %1246 = vmatmul.mubr.msk.bf16.vlgmr.msra.gmra.mrb[0].mxu0 %vm322_vm1, %v298_v4 }
  0x74   : > { %1257 = vmatprep.mubr.msk.bf16.mxu0 %vm1595_vm0, %v1594_v0 }
 0x146   : > { %v360_v6 = vpop.f32.mrb[0].mxu0 }
 0x147   : > { %v361_v7 = vadd.f32 %v1187_v5, %v360_v6  ;;  %v1247_v8 = vpop.f32.mrb[1].mxu0 }
 0x148   : > { %v363_v9 = vpop.f32.mrb[2].mxu0 }
 0x149   : > { %v1844_v10 = vpack.c.bf16 %v361_v7, %v361_v7  ;;  %v1248_v11 = vpop.f32.mrb[3].mxu0 }
 0x14b   : > { %483 = vrot.lane.b32.xlu1 %v1844_v10, %s1596_s14  ;;  %372 = vrot.lane.b32.xlu0 %v1844_v10, %s1597_s16 }
 0x14f   : > { %485 = vrot.lane.b32.xlu0 %v1844_v10, %s1598_s7 }
 0x1bd   : > { %v373_v12 = vpop.permute.xlu0 %372  ;;  %v484_v16 = vpop.permute.xlu1 %483 }
 0x1be   : > { %v379_v13 = vsel %vm374_vm2, %v373_v12, 0 }
 0x1bf   : > { %1250 = vmatpush3.bf16.xpose.msra.mxu1 %v379_v13 }
 0x1c0   : > { %1261 = vmatprep.subr.bf16.mxu1 %v1594_v0 }
 0x1c1   : > { %v486_v14 = vpop.permute.xlu0 %485 }
 0x1c2   : > { %v491_v15 = vsel %vm374_vm2, %v486_v14, 0 }
 0x1c6   : > { %1252 = vmatmul.mubr.msk.bf16.vlgmr.msra.gmra.mrb[0].mxu1 %vm374_vm2, %v1844_v10 }
 0x1c7   : > { %1262 = vmatpush3.bf16.xpose.msra.mxu1 %v491_v15  ;;  %1263 = vmatprep.mubr.msk.bf16.mxu1 %vm1595_vm0, %v1594_v0 }
 0x1c8   : > { %1273 = vmatprep.subr.bf16.mxu1 %v1594_v0 }
 0x1ce   : > { %1264 = vmatmul.mubr.msk.bf16.vlgmr.msra.gmra.mrb[4].mxu1 %vm374_vm2, %v484_v16 }
 0x1cf   : > { %1275 = vmatprep.mubr.msk.bf16.mxu1 %vm1595_vm0, %v1594_v0  ;;  %1274 = vmatpush3.bf16.msra.mxu1 %v598_v46 }
 0x1d0   : > { %1285 = vmatprep.subr.bf16.mxu1 %v1594_v0 }
 0x299   : > { %v415_v17 = vpop.f32.mrb[0].mxu1 }
 0x29a   : > { %v1253_v18 = vpop.f32.mrb[1].mxu1  ;;  %v421_v19 = vsel %vm374_vm2, %v415_v17, -inf }
 0x29b   : > { %422 = vmax.xlane.f32.xlu1 %v421_v19  ;;  %v418_v20 = vpop.f32.mrb[2].mxu1 }
 0x29c   : > { %v1254_v21 = vpop.f32.mrb[3].mxu1 }
 0x2a1   : > { %v527_v22 = vpop.f32.mrb[4].mxu1 }
 0x2a2   : > { %v1265_v23 = vpop.f32.mrb[5].mxu1  ;;  %v533_v24 = vsel %vm374_vm2, %v527_v22, -inf }
 0x2a3   : > { %534 = vmax.xlane.f32.xlu0 %v533_v24  ;;  %v530_v25 = vpop.f32.mrb[6].mxu1 }
 0x2a4   : > { %v1266_v26 = vpop.f32.mrb[7].mxu1 }
 0x2ac   : > { %543 = vrot.lane.b32.xlu1 %v1844_v10, %s1599_s17 }
 0x2b9   : > { %431 = vrot.lane.b32.xlu0 %v1844_v10, %s1600_s19  ;;  %s1208_s19 = sshll.u32 %s1664_s25, 7  ;;  %s1073_s25 = scalar_lea.sflag [#allocation4], %s1812_s18 }
 0x2bd   : > { %688 = vrot.lane.b32.xlu0 %v1844_v10, %s1601_s12  ;;  %s295_s12 = scalar_lea.vmem [#allocation8], %s1183_s30 }
 0x2c1   : > { %686 = vrot.lane.b32.xlu0 %v1844_v10, %s1602_s20  ;;  %s1086_s20 = sshll.u32 %s295_s12, 4  ;;  %s1946_s20 = int_to_ptr.vmem [resolvable:$true] %s1086_s20 }
 0x2c2   : > { %s1517_s30 = scalar_lea.vmem %s1946_s20, 128 }
 0x2c3   : > { %p1518_p11 = scmp.ne.s32.totalorder %s1946_s20, %s1517_s30 }
 0x2c5   : > { %p1519_p1 = pnand %p1518_p11, %p2009_p0 }
 0x2c7   : > { %p1520_p3 = pneg %p1519_p1 }
 0x328   : > { %v423_v27 = vpop.xlane.xlu1 %422 }
 0x329   : > { %v424_v28 = vsub.f32 %v415_v17, %v423_v27 }
 0x32b   : > { %v425_v29 = vmul.f32 1.442695, %v424_v28 }
 0x32c   : > { %v544_v36 = vpop.permute.xlu1 %543 }
 0x32d   : > { %1415 = vpow2.f32 %v425_v29  ;;  %v549_v39 = vsel %vm436_vm3, %v544_v36, 0 }
 0x330   : > { %v535_v30 = vpop.xlane.xlu0 %534 }
 0x331   : > { %v536_v31 = vsub.f32 %v527_v22, %v535_v30  ;;  %v369_v30 = vld [vmem:[#allocation7 + $0x8] sm:$0xf] }
 0x333   : > { %v537_v32 = vmul.f32 1.442695, %v536_v31  ;;  %v801_v31 = vsel %vm436_vm3, %v369_v30, 0 }
 0x334   : > { %v432_v33 = vpop.permute.xlu0 %431 }
 0x335   : > { %1417 = vpow2.f32 %v537_v32  ;;  %v438_v34 = vsel %vm436_vm3, %v432_v33, 0 }
 0x336   : > { %1256 = vmatpush3.bf16.msra.mxu0 %v438_v34 }
 0x337   : > { %v1416_v35 = vpop.eup %1415  ;;  %1267 = vmatprep.subr.bf16.mxu0 %v1594_v0 }
 0x338   : > { %v427_v37 = vsel %vm374_vm2, %v1416_v35, 0.0  ;;  %v430_v38 = vpack.c.bf16 %v1416_v35, %v1416_v35  ;;  %v689_v47 = vpop.permute.xlu0 %688 }
 0x339   : > { %428 = vadd.xlane.f32.xlu0 %v427_v37  ;;  %v694_v2 = vsel %vm374_vm2, %v689_v47, 0 }
 0x33a   : > { %1258 = vmatmul.mubr.msk.bf16.vlgmr.msra.gmra.mrb[4].mxu0 %vm374_vm2, %v430_v38 }
 0x33b   : > { %1268 = vmatpush3.bf16.msra.mxu0 %v549_v39  ;;  %1269 = vmatprep.mubr.msk.bf16.mxu0 %vm1595_vm0, %v1594_v0 }
 0x33c   : > { %1279 = vmatprep.subr.bf16.mxu0 %v1594_v0  ;;  %v687_v48 = vpop.permute.xlu0 %686 }
 0x33f   : > { %v1418_v40 = vpop.eup %1417 }
 0x340   : > { %v539_v41 = vsel %vm374_vm2, %v1418_v40, 0.0  ;;  %v542_v42 = vpack.c.bf16 %v1418_v40, %v1418_v40 }
 0x341   : > { %540 = vadd.xlane.f32.xlu1 %v539_v41 }
 0x342   : > { %1270 = vmatmul.mubr.msk.bf16.vlgmr.msra.gmra.mrb[8].mxu0 %vm374_vm2, %v542_v42 }
 0x343   : > { %1281 = vmatprep.mubr.msk.bf16.mxu0 %vm1595_vm0, %v1594_v0  ;;  %1280 = vmatpush3.bf16.msra.mxu0 %v644_v44 }
 0x344   : > { %1291 = vmatprep.subr.bf16.mxu0 %v1594_v0 }
 0x34f   : > { %846 = vrot.lane.b32.xlu0 %v1844_v10, %s1603_s15 }
 0x3c6   : > { %v429_v49 = vpop.xlane.xlu0 %428 }
 0x3c7   : > { %1419 = vrcp.f32 %v429_v49 }
 0x3ca   : > { %v847_v25 = vpop.permute.xlu0 %846 }
 0x3cb   : > { %v852_v28 = vsel %vm374_vm2, %v847_v25, 0 }
 0x3ce   : > { %v541_v50 = vpop.xlane.xlu1 %540 }
 0x3cf   : > { %1421 = vrcp.f32 %v541_v50 }
 0x3d1   : > { %v1420_v51 = vpop.eup %1419 }
 0x3d9   : > { %v1422_v58 = vpop.eup %1421 }
 0x40d   : > { %v474_v52 = vpop.f32.mrb[4].mxu0 }
 0x40e   : > { %v481_v53 = vmul.f32 %v1420_v51, %v474_v52  ;;  %v1259_v54 = vpop.f32.mrb[5].mxu0 }
 0x40f   : > { %v477_v55 = vpop.f32.mrb[6].mxu0 }
 0x410   : > { %v482_v56 = vpack.c.bf16 %v481_v53, %v481_v53  ;;  %v1260_v57 = vpop.f32.mrb[7].mxu0 }
 0x411   : > { %v370_v57 = vld [vmem:[#allocation7 + $0xc] sm:$0xf] }
 0x412   : > { %1282 = vmatmul.mubr.msk.bf16.vlgmr.msra.gmra.mrb[12].mxu0 %vm374_vm2, %v482_v56 }
 0x413   : > { %1293 = vmatprep.mubr.msk.bf16.mxu0 %vm1595_vm0, %v1594_v0 }
 0x415   : > { %v585_v59 = vpop.f32.mrb[8].mxu0 }
 0x416   : > { %v592_v60 = vmul.f32 %v1422_v58, %v585_v59  ;;  %v1271_v61 = vpop.f32.mrb[9].mxu0  ;;  %v959_v58 = vsel %vm436_vm3, %v370_v57, 0 }
 0x417   : > { %v588_v62 = vpop.f32.mrb[10].mxu0 }
 0x418   : > { %v593_v63 = vpack.c.bf16 %v592_v60, %v592_v60  ;;  %v1272_v1 = vpop.f32.mrb[11].mxu0 }
 0x41a   : > { %1276 = vmatmul.mubr.msk.bf16.vlgmr.msra.gmra.mrb[8].mxu1 %vm374_vm2, %v593_v63 }
 0x41b   : > { %1286 = vmatpush3.bf16.xpose.msra.mxu1 %v694_v2  ;;  %1287 = vmatprep.mubr.msk.bf16.mxu1 %vm1595_vm0, %v1594_v0 }
 0x41c   : > { %1297 = vmatprep.subr.bf16.mxu1 %v1594_v0 }
 0x422   : > { %1288 = vmatmul.mubr.msk.bf16.vlgmr.msra.gmra.mrb[12].mxu1 %vm374_vm2, %v687_v48 }
 0x423   : > { %1299 = vmatprep.mubr.msk.bf16.mxu1 %vm1595_vm0, %v1594_v0  ;;  %1298 = vmatpush3.bf16.msra.mxu1 %v801_v31 }
 0x424   : > { %1309 = vmatprep.subr.bf16.mxu1 %v1594_v0 }
 0x4e5   : > { %v680_v4 = vpop.f32.mrb[12].mxu0 }
 0x4e6   : > { %v1283_v5 = vpop.f32.mrb[13].mxu0 }
 0x4e7   : > { %v683_v6 = vpop.f32.mrb[14].mxu0  ;;  %v1413_v5 = vld [vmem:[%s1994_s5] sm:$0xff]  }
 0x4e8   : > { %v1284_v7 = vpop.f32.mrb[15].mxu0  ;;  %v1414_v6 = vld [vmem:[%s1994_s5 + $0x8] sm:$0xff]  }
 0x4ed   : > { %v634_v8 = vpop.f32.mrb[8].mxu1 }
 0x4ee   : > { %v1894_v9 = vadd.f32 %v680_v4, %v634_v8  ;;  %v1277_v11 = vpop.f32.mrb[9].mxu1  ;;  %v1203_v8 = vld [vmem:[%s1993_s4] ss:$0 sm:$0xff] }
 0x4ef   : > { %v637_v12 = vpop.f32.mrb[10].mxu1 }
 0x4f0   : > { %v1278_v13 = vpop.f32.mrb[11].mxu1 }
 0x4f5   : > { %v730_v14 = vpop.f32.mrb[12].mxu1 }
 0x4f6   : > { %v1289_v15 = vpop.f32.mrb[13].mxu1  ;;  %v736_v16 = vsel %vm374_vm2, %v730_v14, -inf }
 0x4f7   : > { %737 = vmax.xlane.f32.xlu1 %v736_v16  ;;  %v733_v17 = vpop.f32.mrb[14].mxu1 }
 0x4f8   : > { %v1290_v18 = vpop.f32.mrb[15].mxu1 }
 0x508   : > { %746 = vrot.lane.b32.xlu1 %v1844_v10, %s1604_s8 }
 0x50c   : > { %844 = vrot.lane.b32.xlu1 %v1844_v10, %s1605_s13  ;;  %s1944_s13 = scalar_lea.hbm %s1995_s6, %s1208_s19 }
 0x584   : > { %v738_v19 = vpop.xlane.xlu1 %737 }
 0x585   : > { %v739_v20 = vsub.f32 %v730_v14, %v738_v19 }
 0x587   : > { %v740_v21 = vmul.f32 1.442695, %v739_v20 }
 0x588   : > { %v747_v22 = vpop.permute.xlu1 %746 }
 0x589   : > { %1423 = vpow2.f32 %v740_v21  ;;  %v752_v23 = vsel %vm436_vm3, %v747_v22, 0 }
 0x58a   : > { %1292 = vmatpush3.bf16.msra.mxu0 %v752_v23 }
 0x58b   : > { %1303 = vmatprep.subr.bf16.mxu0 %v1594_v0 }
 0x58c   : > { %v845_v29 = vpop.permute.xlu1 %844 }
 0x593   : > { %v1424_v24 = vpop.eup %1423 }
 0x594   : > { %v742_v26 = vsel %vm374_vm2, %v1424_v24, 0.0  ;;  %v745_v27 = vpack.c.bf16 %v1424_v24, %v1424_v24 }
 0x595   : > { %743 = vadd.xlane.f32.xlu1 %v742_v26 }
 0x596   : > { %1294 = vmatmul.mubr.msk.bf16.vlgmr.msra.gmra.mrb[16].mxu0 %vm374_vm2, %v745_v27 }
 0x597   : > { %1304 = vmatpush3.bf16.xpose.msra.mxu0 %v852_v28  ;;  %1305 = vmatprep.mubr.msk.bf16.mxu0 %vm1595_vm0, %v1594_v0 }
 0x598   : > { %1315 = vmatprep.subr.bf16.mxu0 %v1594_v0 }
 0x59e   : > { %1306 = vmatmul.mubr.msk.bf16.vlgmr.msra.gmra.mrb[20].mxu0 %vm374_vm2, %v845_v29 }
 0x59f   : > { %1317 = vmatprep.mubr.msk.bf16.mxu0 %vm1595_vm0, %v1594_v0  ;;  %1316 = vmatpush3.bf16.msra.mxu0 %v959_v58 }
 0x622   : > { %v744_v32 = vpop.xlane.xlu1 %743 }
 0x623   : > { %1425 = vrcp.f32 %v744_v32 }
 0x62d   : > { %v1426_v33 = vpop.eup %1425 }
 0x669   : > { %v788_v34 = vpop.f32.mrb[16].mxu0 }
 0x66a   : > { %v795_v35 = vmul.f32 %v1426_v33, %v788_v34  ;;  %v1295_v36 = vpop.f32.mrb[17].mxu0 }
 0x66b   : > { %v791_v37 = vpop.f32.mrb[18].mxu0 }
 0x66c   : > { %v796_v38 = vpack.c.bf16 %v795_v35, %v795_v35  ;;  %v1296_v39 = vpop.f32.mrb[19].mxu0 }
 0x66e   : > { %1300 = vmatmul.mubr.msk.bf16.vlgmr.msra.gmra.mrb[16].mxu1 %vm374_vm2, %v796_v38 }
 0x66f   : > { %1311 = vmatprep.mubr.msk.bf16.mxu1 %vm1595_vm0, %v1594_v0 }
 0x671   : > { %v888_v40 = vpop.f32.mrb[20].mxu0 }
 0x672   : > { %v1307_v41 = vpop.f32.mrb[21].mxu0  ;;  %v894_v42 = vsel %vm374_vm2, %v888_v40, -inf }
 0x673   : > { %895 = vmax.xlane.f32.xlu0 %v894_v42  ;;  %v891_v43 = vpop.f32.mrb[22].mxu0 }
 0x674   : > { %v1308_v44 = vpop.f32.mrb[23].mxu0 }
 0x689   : > { %904 = vrot.lane.b32.xlu0 %v1844_v10, %s1606_s10  ;;  %s1607_s10 = smov [#allocation8]  }
 0x68a   : > { %s1521_s27 = sshll.u32 %s1607_s10, 4  ;;  %s1522_s27 = int_to_ptr.vmem [resolvable:$false] %s1521_s27 }
 0x68b   : > { %s1523_s29 = scalar_lea.vmem %s1522_s27, 256  ;;  %p1524_p7 = scmp.lt.s32.totalorder %s1946_s20, %s1522_s27 }
 0x68c   : > { %p1525_p9 = scmp.lt.s32.totalorder %s1523_s29, %s1517_s30 }
 0x68e   : > { %p1526_p12 = por %p1525_p9, %p1524_p7 }
 0x690   : > { %p1527_p2 = pnand %p1526_p12, %p1520_p3 }
 0x700   : > { %v896_v45 = vpop.xlane.xlu0 %895 }
 0x701   : > { %v897_v46 = vsub.f32 %v888_v40, %v896_v45 }
 0x703   : > { %v898_v47 = vmul.f32 1.442695, %v897_v46 }
 0x704   : > { %v905_v48 = vpop.permute.xlu0 %904 }
 0x705   : > { %1427 = vpow2.f32 %v898_v47  ;;  %v910_v49 = vsel %vm436_vm3, %v905_v48, 0 }
 0x706   : > { %1310 = vmatpush3.bf16.msra.mxu1 %v910_v49 }
 0x707   : > { %1321 = vmatprep.subr.bf16.mxu1 %v1594_v0 }
 0x70f   : > { %v1428_v50 = vpop.eup %1427 }
 0x710   : > { %v900_v51 = vsel %vm374_vm2, %v1428_v50, 0.0  ;;  %v903_v52 = vpack.c.bf16 %v1428_v50, %v1428_v50 }
 0x711   : > { %901 = vadd.xlane.f32.xlu1 %v900_v51 }
 0x712   : > { %1312 = vmatmul.mubr.msk.bf16.vlgmr.msra.gmra.mrb[20].mxu1 %vm374_vm2, %v903_v52 }
 0x713   : > { %1325 = vmatprep.mubr.msk.bf16.mxu1 %vm1595_vm0, %v1594_v0  ;;  %1322 = vmatpush3.bf16.msra.mxu1 %v1413_v5 }
 0x714   : > { %1323 = vmatprep.subr.bf16.mxu1 %v1594_v0 }
 0x717   : > { %1324 = vmatpush3.bf16.msra.mxu1 %v1414_v6 }
 0x741   : > { %v837_v10 = vpop.f32.mrb[16].mxu1 }
 0x742   : > { %v843_v53 = vadd.f32 %v837_v10, %v1894_v9  ;;  %v1301_v54 = vpop.f32.mrb[17].mxu1 }
 0x743   : > { %v840_v55 = vpop.f32.mrb[18].mxu1 }
 0x744   : > { %v1302_v56 = vpop.f32.mrb[19].mxu1 }
 0x79e   : > { %v902_v59 = vpop.xlane.xlu1 %901 }
 0x79f   : > { %1429 = vrcp.f32 %v902_v59 }
 0x7a9   : > { %v1430_v60 = vpop.eup %1429 }
 0x7e5   : > { %v946_v61 = vpop.f32.mrb[20].mxu1 }
 0x7e6   : > { %v953_v62 = vmul.f32 %v1430_v60, %v946_v61  ;;  %v1313_v63 = vpop.f32.mrb[21].mxu1 }
 0x7e7   : > { %v949_v1 = vpop.f32.mrb[22].mxu1 }
 0x7e8   : > { %v954_v2 = vpack.c.bf16 %v953_v62, %v953_v62  ;;  %v1314_v4 = vpop.f32.mrb[23].mxu1 }
 0x7ea   : > { %1318 = vmatmul.mubr.msk.bf16.vlgmr.msra.gmra.mrb[24].mxu0 %vm374_vm2, %v954_v2 }
 0x8bd   : > { %v995_v7 = vpop.f32.mrb[24].mxu0 }
 0x8be   : > { %v1001_v9 = vadd.f32 %v995_v7, %v843_v53  ;;  %v1319_v11 = vpop.f32.mrb[25].mxu0 }
 0x8bf   : > { %v998_v12 = vpop.f32.mrb[26].mxu0 }
 0x8c0   : > { %v1009_v13 = vadd.f32 %v1203_v8, %v1001_v9  ;;  %v1320_v14 = vpop.f32.mrb[27].mxu0 }
 0x8c2   : > { %v1010_v15 = vadd.f32 %v1009_v13, %v1832_v3 }
 0x8c4   : > { %v1011_v16 = vpack.c.bf16 %v1010_v15, %v1010_v15 }
 0x8c6   : > { %1326 = vmatmul.mubr.msk.bf16.vlgmr.msra.gmra.mrb[24].mxu1 %vm322_vm1, %v1011_v16 }
 0x999   : > { %v1065_v0 = vpop.f32.mrb[24].mxu1 }
 0x99a   : > { %v1066_v17 = vadd.f32 %v1065_v0, %v1010_v15  ;;  %v1327_v18 = vpop.f32.mrb[25].mxu1 }
 0x99b   : > { %v1068_v3 = vpop.f32.mrb[26].mxu1 }
 0x99c   : > { %v1328_v19 = vpop.f32.mrb[27].mxu1  ;;  %1071 = vst.msk [vmem:[%s295_s12] sm:$0xff] %vm322_vm1, %v1066_v17 }
 0x99d   : > { %1530 = shalt.err (!%p1527_p2)
}
 0x99e   : > { %s1531_s18 = scalar_lea.hbm %s1944_s13, 128  ;;  %s1535_s7 = scalar_lea.hbm %s1995_s6, 256 }
 0x99f   : > { %p1532_p13 = scmp.ne.s32.totalorder %s1944_s13, %s1531_s18  ;;  %p1536_p4 = scmp.lt.u32.totalorder %s1944_s13, %s1995_s6 }
 0x9a0   : > { %p1537_p5 = scmp.lt.u32.totalorder %s1535_s7, %s1531_s18  ;;  %p1539_p11 = scmp.lt.u32.totalorder %s1531_s18, %s1944_s13 }
 0x9a1   : > { %p1533_p6 = pnand %p1532_p13, %p2009_p0 }
 0x9a2   : > { %p1538_p8 = por %p1537_p5, %p1536_p4 }
 0x9a3   : > { %p1534_p10 = pneg %p1533_p6 }
 0x9a4   : > { %p1540_p1 = por %p1539_p11, %p1538_p8 }
 0x9a6   : > { %p1541_p3 = pnand %p1540_p1, %p1534_p10 }
 0x9a8   : > { %1544 = shalt.err (!%p1541_p3)
}
 0x9a9   : > { %1339 = dma.vmem_to_hbm [thread:$0]  (%p2009_p0), %s1946_s20, 128, %s1944_s13, %s1073_s25  }
 0x9aa PF: > { %s1098_s12 = sand.u32 1, %s1575_s21   ;;  %p2010_p7 = scmp.ne.s32.totalorder %s2000_s28, 0 }
 0x9ab   : > { %p2011_p9 = scmp.ge.s32.totalorder %s1587_s24, 2  ;;  %s1099_s15 = scalar_lea.sflag [#allocation4], %s1098_s12 }
 0x9ad   : > { %p1353_p12 = pnand %p2011_p9, %p2010_p7 }
 0x9af   : > { %1570 = dma.done.wait (!%p1353_p12), %s1099_s15, 128  }
 0x9b0   : > { %1572 = vsyncadd (!%p1353_p12), %s1099_s15, 4294967168  ;;  %p20_p2 = scmp.ge.s32.totalorder %s1753_s26, 4   ;;  %s2012_s21 = smov %s1579_s22 }
 0x9b1   : > { %s2013_s22 = smov %s1583_s23  ;;  %s2014_s23 = smov %s1769_s11 }
 0x9b2   : > { %s2015_s24 = smov %s1753_s26  ;;  %22 = sbr.rel (!%p20_p2) target bundleno = 6 (0x6), region = 97 }
 0x9b9   :  { %1104 = vsyncpa [#allocation3], 1 }
 0x9ba   :  { %1106 = vsyncpa [#allocation3 + $0x1], 1 }
 0x9bb   :  { %1107 = vsyncpa [#allocation6], 1 }
 0x9bc   :  { %1108 = vsyncpa [#allocation4], 1 }
 0x9bd   :  { %1110 = vsyncpa [#allocation4 + $0x1], 1 }

</bundles_post_ra>
